<compile_context>
chip_gen: v5e
topology: v5e:2x2
jax: 0.10.0
libtpu: 0.0.40
codegen_flags: <defaults>
</compile_context>

<pallas_src>
from functools import partial

import jax
import jax.numpy as jnp
import numpy as np
from jax.experimental import pallas as pl
from jax.experimental.pallas import tpu as pltpu


# --------------------- fused bidirectional LSTM layer kernel -----------------
def _bilstm_dir_kernel(x_ref, wih_ref, whh_ref, b_ref, hseq_ref, hn_ref, gx_ref):
    """One direction of one LSTM layer per grid step (grid axis 0 = direction).

    x_ref    : (T*B, Din)        time-major flattened input (shared by both dirs)
    wih_ref  : (1, Din, 4H)      per-direction input weights
    whh_ref  : (1, H, 4H)        per-direction recurrent weights
    b_ref    : (1, 1, 4H)        per-direction combined bias (b_ih + b_hh)
    hseq_ref : (1, T, B, H)      per-direction output hidden sequence
    hn_ref   : (1, B, H)         per-direction final hidden state
    gx_ref   : (T, B, 4H) VMEM   scratch holding the hoisted input projection
    """
    d = pl.program_id(0)                      # 0 = forward, 1 = backward
    T, B, _ = gx_ref.shape
    H = hn_ref.shape[-1]

    # --- hoisted, time-parallel input projection: one big MXU matmul ----------
    gx = jnp.dot(x_ref[...], wih_ref[0],
                 preferred_element_type=jnp.float32) + b_ref[0]      # (T*B, 4H)
    # Unpack into a time-indexed scratch with static slices so the recurrent
    # loop only ever does dynamic indexing on a leading (untiled) axis.
    for t in range(T):
        gx_ref[t] = gx[t * B:(t + 1) * B, :]

    whh = whh_ref[0]                                                  # (H, 4H)
    reverse = d == 1

    def step(s, carry):
        h, c = carry
        t = jnp.where(reverse, T - 1 - s, s)      # reversal = index arithmetic
        gates = gx_ref[t] + jnp.dot(h, whh, preferred_element_type=jnp.float32)
        i = jax.nn.sigmoid(gates[:, 0 * H:1 * H])
        f = jax.nn.sigmoid(gates[:, 1 * H:2 * H])
        g = jnp.tanh(gates[:, 2 * H:3 * H])
        o = jax.nn.sigmoid(gates[:, 3 * H:4 * H])
        c = f * c + i * g
        h = o * jnp.tanh(c)
        hseq_ref[0, t] = h                        # natural (original-time) order
        return (h, c)

    h0 = jnp.zeros((B, H), jnp.float32)
    c0 = jnp.zeros((B, H), jnp.float32)
    h_last, _ = jax.lax.fori_loop(0, T, step, (h0, c0), unroll=True)
    hn_ref[0] = h_last                            # written once, after the loop


def bilstm_layer(x2d, wih, whh, b, *, seq_len, batch):
    """x2d: (T*B, Din) time-major.  Returns hseq (2, T, B, H), hn (2, B, H)."""
    TB, Din = x2d.shape
    H = whh.shape[1]
    return pl.pallas_call(
        _bilstm_dir_kernel,
        out_shape=(jax.ShapeDtypeStruct((2, seq_len, batch, H), jnp.float32),
                   jax.ShapeDtypeStruct((2, batch, H), jnp.float32)),
        grid=(2,),
        in_specs=[
            pl.BlockSpec((TB, Din), lambda d: (0, 0)),            # shared x read
            pl.BlockSpec((1, Din, 4 * H), lambda d: (d, 0, 0)),   # W_ih[dir]
            pl.BlockSpec((1, H, 4 * H), lambda d: (d, 0, 0)),     # W_hh[dir]
            pl.BlockSpec((1, 1, 4 * H), lambda d: (d, 0, 0)),     # bias[dir]
        ],
        out_specs=(
            pl.BlockSpec((1, seq_len, batch, H), lambda d: (d, 0, 0, 0)),
            pl.BlockSpec((1, batch, H), lambda d: (d, 0, 0)),
        ),
        scratch_shapes=[pltpu.VMEM((seq_len, batch, 4 * H), jnp.float32)],
        compiler_params=pltpu.CompilerParams(
            dimension_semantics=("parallel",)),   # fwd/bwd on separate TCs (v7x)
    )(x2d, wih, whh, b)


# ----------------------------- Final linear layer ----------------------------
def _fc_kernel(x_ref, w_ref, b_ref, o_ref):
    o_ref[...] = (jnp.dot(x_ref[...], w_ref[...],
                          preferred_element_type=jnp.float32) + b_ref[...])


def linear(x, w, b):
    B = x.shape[0]
    C = w.shape[1]
    return pl.pallas_call(
        _fc_kernel,
        out_shape=jax.ShapeDtypeStruct((B, C), jnp.float32),
    )(x, w, b.reshape(1, C))


# ----------------------------- Full forward ----------------------------------
@partial(jax.jit, static_argnums=2)
def text_rnn_forward(params, x_ids, num_layers):
    B, T = x_ids.shape
    # Embedding lookup is a data-dependent gather -> kept in plain JAX glue.
    # TODO(synk): dropout omitted (inference / eval-mode identity).
    emb = params["embedding"][x_ids]                       # (B, T, E)
    layer_in = jnp.transpose(emb, (1, 0, 2)).reshape(T * B, -1)   # (T*B, E)
    hn_list = []
    for layer in range(num_layers):
        wih, whh, b = params[f"l{layer}"]
        hseq, hn = bilstm_layer(layer_in, wih, whh, b, seq_len=T, batch=B)
        hn_list += [hn[0], hn[1]]          # PyTorch h_n order: L0f, L0b, L1f, L1b
        # next-layer input: per (t, b) row, concat [fwd_h | bwd_h]
        layer_in = jnp.transpose(hseq, (1, 2, 0, 3)).reshape(T * B, -1)
        # inter-layer nn.LSTM dropout / self.dropout: identity at inference
    feat = jnp.concatenate(hn_list, axis=-1)               # (B, num_layers*2*H)
    return linear(feat, params["fc_w"], params["fc_b"])


# ----------------------------- Pure-JAX reference ----------------------------
def _lstm_ref(x_tbd, w_ih, w_hh, b):
    H = w_hh.shape[0]
    B = x_tbd.shape[1]

    def step(carry, x_t):
        h, c = carry
        gates = x_t @ w_ih + h @ w_hh + b
        i = jax.nn.sigmoid(gates[:, :H])
        f = jax.nn.sigmoid(gates[:, H:2 * H])
        g = jnp.tanh(gates[:, 2 * H:3 * H])
        o = jax.nn.sigmoid(gates[:, 3 * H:])
        c = f * c + i * g
        h = o * jnp.tanh(c)
        return (h, c), h

    init = (jnp.zeros((B, H), jnp.float32), jnp.zeros((B, H), jnp.float32))
    (h, _), outs = jax.lax.scan(step, init, x_tbd)
    return outs, h


def text_rnn_reference(params, x_ids, num_layers):
    emb = params["embedding"][x_ids]
    layer_in = jnp.transpose(emb, (1, 0, 2))               # (T, B, E)
    hn_list = []
    for layer in range(num_layers):
        wih, whh, b = params[f"l{layer}"]
        out_f, h_f = _lstm_ref(layer_in, wih[0], whh[0], b[0])
        out_b_rev, h_b = _lstm_ref(layer_in[::-1], wih[1], whh[1], b[1])
        hn_list += [h_f, h_b]
        layer_in = jnp.concatenate([out_f, out_b_rev[::-1]], axis=-1)
    feat = jnp.concatenate(hn_list, axis=-1)
    return feat @ params["fc_w"] + params["fc_b"]


# ----------------------------- Parameter init --------------------------------
def init_params(key, vocab, E, H, L, C):
    keys = iter(jax.random.split(key, 64))
    params = {"embedding": (jax.random.normal(next(keys), (vocab, E)) * 0.1
                            ).astype(jnp.float32)}
    k = 1.0 / np.sqrt(H)
    for layer in range(L):
        din = E if layer == 0 else 2 * H
        # stacked per-direction weights: index 0 = forward, 1 = backward
        w_ih = jax.random.uniform(next(keys), (2, din, 4 * H), minval=-k, maxval=k)
        w_hh = jax.random.uniform(next(keys), (2, H, 4 * H), minval=-k, maxval=k)
        b_ih = jax.random.uniform(next(keys), (2, 4 * H), minval=-k, maxval=k)
        b_hh = jax.random.uniform(next(keys), (2, 4 * H), minval=-k, maxval=k)
        params[f"l{layer}"] = (
            w_ih.astype(jnp.float32),
            w_hh.astype(jnp.float32),
            (b_ih + b_hh).reshape(2, 1, 4 * H).astype(jnp.float32),
        )
    kf = 1.0 / np.sqrt(L * 2 * H)
    params["fc_w"] = jax.random.uniform(next(keys), (L * 2 * H, C),
                                        minval=-kf, maxval=kf).astype(jnp.float32)
    params["fc_b"] = jax.random.uniform(next(keys), (C,),
                                        minval=-kf, maxval=kf).astype(jnp.float32)
    return params


if __name__ == "__main__":
    B, T, VOCAB, E, H, L, C = 2, 8, 50, 32, 32, 2, 4
    key = jax.random.PRNGKey(0)
    kp, kx = jax.random.split(key)
    params = init_params(kp, VOCAB, E, H, L, C)
    x_ids = jax.random.randint(kx, (B, T), 0, VOCAB)          # token ids (B, T)

    logits = jax.block_until_ready(text_rnn_forward(params, x_ids, L))
    ref = jax.block_until_ready(text_rnn_reference(params, x_ids, L))

    assert logits.shape == (B, C)
    np.testing.assert_allclose(np.asarray(logits), np.asarray(ref),
                               rtol=1e-4, atol=1e-4)
    print("KERNEL_OK")
</pallas_src>

<mosaic_0001>
module attributes {stable_mosaic.version = 11 : i64} {
  func.func @_fc_kernel(%arg0: memref<2x128xf32, #tpu.memory_space<vmem>>, %arg1: memref<128x4xf32, #tpu.memory_space<vmem>>, %arg2: memref<1x4xf32, #tpu.memory_space<vmem>>, %arg3: memref<2x4xf32, #tpu.memory_space<vmem>>) attributes {dimension_semantics = [], scalar_prefetch = 0 : i64, scratch_operands = 0 : i64, tpu.core_type = #tpu.core_type<tc>} {
    %c0 = arith.constant 0 : index
    %c0_0 = arith.constant 0 : index
    %0 = vector.load %arg0[%c0, %c0_0] : memref<2x128xf32, #tpu.memory_space<vmem>>, vector<2x128xf32>
    %c0_1 = arith.constant 0 : index
    %c0_2 = arith.constant 0 : index
    %1 = vector.load %arg1[%c0_1, %c0_2] : memref<128x4xf32, #tpu.memory_space<vmem>>, vector<128x4xf32>
    %cst = arith.constant dense<0.000000e+00> : vector<2x4xf32>
    %2 = tpu.matmul %0, %1, %cst {dimension_numbers = #tpu.dot_dimension_numbers<[1], [0], [0], [1], [0, 0, 1, 1], [], []>} : vector<2x128xf32>, vector<128x4xf32>, vector<2x4xf32> -> vector<2x4xf32>
    %c0_3 = arith.constant 0 : index
    %c0_4 = arith.constant 0 : index
    %3 = vector.load %arg2[%c0_3, %c0_4] : memref<1x4xf32, #tpu.memory_space<vmem>>, vector<1x4xf32>
    %4 = vector.broadcast %3 : vector<1x4xf32> to vector<2x4xf32>
    %5 = arith.addf %2, %4 : vector<2x4xf32>
    %c0_5 = arith.constant 0 : index
    %c0_6 = arith.constant 0 : index
    %6 = vector.load %arg3[%c0_5, %c0_6] : memref<2x4xf32, #tpu.memory_space<vmem>>, vector<2x4xf32>
    tpu.vector_store %arg3[%c0_5, %c0_6], %5 {strides = array<i32>} : memref<2x4xf32, #tpu.memory_space<vmem>>, vector<2x4xf32>,
    return
  }
}

module attributes {stable_mosaic.version = 11 : i64} {
  func.func @_bilstm_dir_kernel(%arg0: i32, %arg1: memref<16x32xf32, #tpu.memory_space<vmem>>, %arg2: memref<1x32x128xf32, #tpu.memory_space<vmem>>, %arg3: memref<1x32x128xf32, #tpu.memory_space<vmem>>, %arg4: memref<1x1x128xf32, #tpu.memory_space<vmem>>, %arg5: memref<1x8x2x32xf32, #tpu.memory_space<vmem>>, %arg6: memref<1x2x32xf32, #tpu.memory_space<vmem>>, %arg7: memref<8x2x128xf32, #tpu.memory_space<vmem>>) attributes {dimension_semantics = [#tpu.dimension_semantics<parallel>], iteration_bounds = array<i64: 2>, scalar_prefetch = 0 : i64, scratch_operands = 1 : i64, tpu.core_type = #tpu.core_type<tc>, window_params = [{pipeline_mode = #tpu.pipeline_mode<synchronous>, transform_indices = @transform_0, window_bounds = array<i64: 16, 32>}, {transform_indices = @transform_1, window_bounds = array<i64: 1, 32, 128>}, {transform_indices = @transform_2, window_bounds = array<i64: 1, 32, 128>}, {transform_indices = @transform_3, window_bounds = array<i64: 1, 1, 128>}, {transform_indices = @transform_4, window_bounds = array<i64: 1, 8, 2, 32>}, {transform_indices = @transform_5, window_bounds = array<i64: 1, 2, 32>}]} {
    %c0 = arith.constant 0 : index
    %c0_0 = arith.constant 0 : index
    %0 = vector.load %arg1[%c0, %c0_0] : memref<16x32xf32, #tpu.memory_space<vmem>>, vector<16x32xf32>
    %c0_1 = arith.constant 0 : index
    %c0_2 = arith.constant 0 : index
    %c0_3 = arith.constant 0 : index
    %1 = vector.load %arg2[%c0_1, %c0_2, %c0_3] : memref<1x32x128xf32, #tpu.memory_space<vmem>>, vector<1x32x128xf32>
    %2 = vector.shape_cast %1 : vector<1x32x128xf32> to vector<32x128xf32>
    %cst = arith.constant dense<0.000000e+00> : vector<16x128xf32>
    %3 = tpu.matmul %0, %2, %cst {dimension_numbers = #tpu.dot_dimension_numbers<[1], [0], [0], [1], [0, 0, 1, 1], [], []>} : vector<16x32xf32>, vector<32x128xf32>, vector<16x128xf32> -> vector<16x128xf32>
    %c0_4 = arith.constant 0 : index
    %c0_5 = arith.constant 0 : index
    %c0_6 = arith.constant 0 : index
    %4 = vector.load %arg4[%c0_4, %c0_5, %c0_6] : memref<1x1x128xf32, #tpu.memory_space<vmem>>, vector<1x1x128xf32>
    %5 = vector.shape_cast %4 : vector<1x1x128xf32> to vector<1x128xf32>
    %6 = vector.broadcast %5 : vector<1x128xf32> to vector<16x128xf32>
    %7 = arith.addf %3, %6 : vector<16x128xf32>
    %8 = vector.extract_strided_slice %7 {offsets = [0, 0], sizes = [2, 128], strides = [1, 1]} : vector<16x128xf32> to vector<2x128xf32>
    %c0_7 = arith.constant 0 : index
    %c0_8 = arith.constant 0 : index
    %c0_9 = arith.constant 0 : index
    %9 = vector.load %arg7[%c0_7, %c0_8, %c0_9] : memref<8x2x128xf32, #tpu.memory_space<vmem>>, vector<1x2x128xf32>
    %10 = vector.shape_cast %9 : vector<1x2x128xf32> to vector<2x128xf32>
    %11 = vector.shape_cast %8 : vector<2x128xf32> to vector<1x2x128xf32>
    tpu.vector_store %arg7[%c0_7, %c0_8, %c0_9], %11 {strides = array<i32>} : memref<8x2x128xf32, #tpu.memory_space<vmem>>, vector<1x2x128xf32>,
    %12 = vector.extract_strided_slice %7 {offsets = [2, 0], sizes = [2, 128], strides = [1, 1]} : vector<16x128xf32> to vector<2x128xf32>
    %c1 = arith.constant 1 : index
    %c0_10 = arith.constant 0 : index
    %c0_11 = arith.constant 0 : index
    %13 = vector.load %arg7[%c1, %c0_10, %c0_11] : memref<8x2x128xf32, #tpu.memory_space<vmem>>, vector<1x2x128xf32>
    %14 = vector.shape_cast %13 : vector<1x2x128xf32> to vector<2x128xf32>
    %15 = vector.shape_cast %12 : vector<2x128xf32> to vector<1x2x128xf32>
    tpu.vector_store %arg7[%c1, %c0_10, %c0_11], %15 {strides = array<i32>} : memref<8x2x128xf32, #tpu.memory_space<vmem>>, vector<1x2x128xf32>,
    %16 = vector.extract_strided_slice %7 {offsets = [4, 0], sizes = [2, 128], strides = [1, 1]} : vector<16x128xf32> to vector<2x128xf32>
    %c2 = arith.constant 2 : index
    %c0_12 = arith.constant 0 : index
    %c0_13 = arith.constant 0 : index
    %17 = vector.load %arg7[%c2, %c0_12, %c0_13] : memref<8x2x128xf32, #tpu.memory_space<vmem>>, vector<1x2x128xf32>
    %18 = vector.shape_cast %17 : vector<1x2x128xf32> to vector<2x128xf32>
    %19 = vector.shape_cast %16 : vector<2x128xf32> to vector<1x2x128xf32>
    tpu.vector_store %arg7[%c2, %c0_12, %c0_13], %19 {strides = array<i32>} : memref<8x2x128xf32, #tpu.memory_space<vmem>>, vector<1x2x128xf32>,
    %20 = vector.extract_strided_slice %7 {offsets = [6, 0], sizes = [2, 128], strides = [1, 1]} : vector<16x128xf32> to vector<2x128xf32>
    %c3 = arith.constant 3 : index
    %c0_14 = arith.constant 0 : index
    %c0_15 = arith.constant 0 : index
    %21 = vector.load %arg7[%c3, %c0_14, %c0_15] : memref<8x2x128xf32, #tpu.memory_space<vmem>>, vector<1x2x128xf32>
    %22 = vector.shape_cast %21 : vector<1x2x128xf32> to vector<2x128xf32>
    %23 = vector.shape_cast %20 : vector<2x128xf32> to vector<1x2x128xf32>
    tpu.vector_store %arg7[%c3, %c0_14, %c0_15], %23 {strides = array<i32>} : memref<8x2x128xf32, #tpu.memory_space<vmem>>, vector<1x2x128xf32>,
    %24 = vector.extract_strided_slice %7 {offsets = [8, 0], sizes = [2, 128], strides = [1, 1]} : vector<16x128xf32> to vector<2x128xf32>
    %c4 = arith.constant 4 : index
    %c0_16 = arith.constant 0 : index
    %c0_17 = arith.constant 0 : index
    %25 = vector.load %arg7[%c4, %c0_16, %c0_17] : memref<8x2x128xf32, #tpu.memory_space<vmem>>, vector<1x2x128xf32>
    %26 = vector.shape_cast %25 : vector<1x2x128xf32> to vector<2x128xf32>
    %27 = vector.shape_cast %24 : vector<2x128xf32> to vector<1x2x128xf32>
    tpu.vector_store %arg7[%c4, %c0_16, %c0_17], %27 {strides = array<i32>} : memref<8x2x128xf32, #tpu.memory_space<vmem>>, vector<1x2x128xf32>,
    %28 = vector.extract_strided_slice %7 {offsets = [10, 0], sizes = [2, 128], strides = [1, 1]} : vector<16x128xf32> to vector<2x128xf32>
    %c5 = arith.constant 5 : index
    %c0_18 = arith.constant 0 : index
    %c0_19 = arith.constant 0 : index
    %29 = vector.load %arg7[%c5, %c0_18, %c0_19] : memref<8x2x128xf32, #tpu.memory_space<vmem>>, vector<1x2x128xf32>
    %30 = vector.shape_cast %29 : vector<1x2x128xf32> to vector<2x128xf32>
    %31 = vector.shape_cast %28 : vector<2x128xf32> to vector<1x2x128xf32>
    tpu.vector_store %arg7[%c5, %c0_18, %c0_19], %31 {strides = array<i32>} : memref<8x2x128xf32, #tpu.memory_space<vmem>>, vector<1x2x128xf32>,
    %32 = vector.extract_strided_slice %7 {offsets = [12, 0], sizes = [2, 128], strides = [1, 1]} : vector<16x128xf32> to vector<2x128xf32>
    %c6 = arith.constant 6 : index
    %c0_20 = arith.constant 0 : index
    %c0_21 = arith.constant 0 : index
    %33 = vector.load %arg7[%c6, %c0_20, %c0_21] : memref<8x2x128xf32, #tpu.memory_space<vmem>>, vector<1x2x128xf32>
    %34 = vector.shape_cast %33 : vector<1x2x128xf32> to vector<2x128xf32>
    %35 = vector.shape_cast %32 : vector<2x128xf32> to vector<1x2x128xf32>
    tpu.vector_store %arg7[%c6, %c0_20, %c0_21], %35 {strides = array<i32>} : memref<8x2x128xf32, #tpu.memory_space<vmem>>, vector<1x2x128xf32>,
    %36 = vector.extract_strided_slice %7 {offsets = [14, 0], sizes = [2, 128], strides = [1, 1]} : vector<16x128xf32> to vector<2x128xf32>
    %c7 = arith.constant 7 : index
    %c0_22 = arith.constant 0 : index
    %c0_23 = arith.constant 0 : index
    %37 = vector.load %arg7[%c7, %c0_22, %c0_23] : memref<8x2x128xf32, #tpu.memory_space<vmem>>, vector<1x2x128xf32>
    %38 = vector.shape_cast %37 : vector<1x2x128xf32> to vector<2x128xf32>
    %39 = vector.shape_cast %36 : vector<2x128xf32> to vector<1x2x128xf32>
    tpu.vector_store %arg7[%c7, %c0_22, %c0_23], %39 {strides = array<i32>} : memref<8x2x128xf32, #tpu.memory_space<vmem>>, vector<1x2x128xf32>,
    %c0_24 = arith.constant 0 : index
    %c0_25 = arith.constant 0 : index
    %c0_26 = arith.constant 0 : index
    %40 = vector.load %arg3[%c0_24, %c0_25, %c0_26] : memref<1x32x128xf32, #tpu.memory_space<vmem>>, vector<1x32x128xf32>
    %41 = vector.shape_cast %40 : vector<1x32x128xf32> to vector<32x128xf32>
    %c1_i32 = arith.constant 1 : i32
    %42 = arith.cmpi eq, %arg0, %c1_i32 : i32
    %cst_27 = arith.constant 0.000000e+00 : f32
    %43 = vector.broadcast %cst_27 : f32 to vector<2x32xf32>
    %cst_28 = arith.constant 0.000000e+00 : f32
    %44 = vector.broadcast %cst_28 : f32 to vector<2x32xf32>
    %c0_i32 = arith.constant 0 : i32
    %c7_i32 = arith.constant 7 : i32
    %45 = arith.subi %c7_i32, %c0_i32 : i32
    %46 = arith.select %42, %45, %c0_i32 : i32
    %47 = arith.index_cast %46 : i32 to index
    %c0_29 = arith.constant 0 : index
    %c0_30 = arith.constant 0 : index
    %48 = vector.load %arg7[%47, %c0_29, %c0_30] : memref<8x2x128xf32, #tpu.memory_space<vmem>>, vector<1x2x128xf32>
    %49 = vector.shape_cast %48 : vector<1x2x128xf32> to vector<2x128xf32>
    %cst_31 = arith.constant dense<0.000000e+00> : vector<2x128xf32>
    %50 = tpu.matmul %43, %41, %cst_31 {dimension_numbers = #tpu.dot_dimension_numbers<[1], [0], [0], [1], [0, 0, 1, 1], [], []>} : vector<2x32xf32>, vector<32x128xf32>, vector<2x128xf32> -> vector<2x128xf32>
    %51 = arith.addf %49, %50 : vector<2x128xf32>
    %52 = vector.extract_strided_slice %51 {offsets = [0, 0], sizes = [2, 32], strides = [1, 1]} : vector<2x128xf32> to vector<2x32xf32>
    %53 = arith.negf %52 : vector<2x32xf32>
    %54 = math.exp %53 : vector<2x32xf32>
    %cst_32 = arith.constant 1.000000e+00 : f32
    %55 = vector.broadcast %cst_32 : f32 to vector<2x32xf32>
    %56 = arith.addf %55, %54 : vector<2x32xf32>
    %57 = arith.divf %55, %56 : vector<2x32xf32>
    %58 = vector.extract_strided_slice %51 {offsets = [0, 32], sizes = [2, 32], strides = [1, 1]} : vector<2x128xf32> to vector<2x32xf32>
    %59 = arith.negf %58 : vector<2x32xf32>
    %60 = math.exp %59 : vector<2x32xf32>
    %cst_33 = arith.constant 1.000000e+00 : f32
    %61 = vector.broadcast %cst_33 : f32 to vector<2x32xf32>
    %62 = arith.addf %61, %60 : vector<2x32xf32>
    %63 = arith.divf %61, %62 : vector<2x32xf32>
    %64 = vector.extract_strided_slice %51 {offsets = [0, 64], sizes = [2, 32], strides = [1, 1]} : vector<2x128xf32> to vector<2x32xf32>
    %65 = math.tanh %64 : vector<2x32xf32>
    %66 = vector.extract_strided_slice %51 {offsets = [0, 96], sizes = [2, 32], strides = [1, 1]} : vector<2x128xf32> to vector<2x32xf32>
    %67 = arith.negf %66 : vector<2x32xf32>
    %68 = math.exp %67 : vector<2x32xf32>
    %cst_34 = arith.constant 1.000000e+00 : f32
    %69 = vector.broadcast %cst_34 : f32 to vector<2x32xf32>
    %70 = arith.addf %69, %68 : vector<2x32xf32>
    %71 = arith.divf %69, %70 : vector<2x32xf32>
    %72 = arith.mulf %63, %44 : vector<2x32xf32>
    %73 = arith.mulf %57, %65 : vector<2x32xf32>
    %74 = arith.addf %72, %73 : vector<2x32xf32>
    %75 = math.tanh %74 : vector<2x32xf32>
    %76 = arith.mulf %71, %75 : vector<2x32xf32>
    %c0_35 = arith.constant 0 : index
    %77 = arith.index_cast %46 : i32 to index
    %c0_36 = arith.constant 0 : index
    %c0_37 = arith.constant 0 : index
    %78 = vector.load %arg5[%c0_35, %77, %c0_36, %c0_37] : memref<1x8x2x32xf32, #tpu.memory_space<vmem>>, vector<1x1x2x32xf32>
    %79 = vector.shape_cast %78 : vector<1x1x2x32xf32> to vector<2x32xf32>
    %80 = vector.shape_cast %76 : vector<2x32xf32> to vector<1x1x2x32xf32>
    tpu.vector_store %arg5[%c0_35, %77, %c0_36, %c0_37], %80 {strides = array<i32>} : memref<1x8x2x32xf32, #tpu.memory_space<vmem>>, vector<1x1x2x32xf32>,
    %c1_i32_38 = arith.constant 1 : i32
    %c7_i32_39 = arith.constant 7 : i32
    %81 = arith.subi %c7_i32_39, %c1_i32_38 : i32
    %82 = arith.select %42, %81, %c1_i32_38 : i32
    %83 = arith.index_cast %82 : i32 to index
    %c0_40 = arith.constant 0 : index
    %c0_41 = arith.constant 0 : index
    %84 = vector.load %arg7[%83, %c0_40, %c0_41] : memref<8x2x128xf32, #tpu.memory_space<vmem>>, vector<1x2x128xf32>
    %85 = vector.shape_cast %84 : vector<1x2x128xf32> to vector<2x128xf32>
    %cst_42 = arith.constant dense<0.000000e+00> : vector<2x128xf32>
    %86 = tpu.matmul %76, %41, %cst_42 {dimension_numbers = #tpu.dot_dimension_numbers<[1], [0], [0], [1], [0, 0, 1, 1], [], []>} : vector<2x32xf32>, vector<32x128xf32>, vector<2x128xf32> -> vector<2x128xf32>
    %87 = arith.addf %85, %86 : vector<2x128xf32>
    %88 = vector.extract_strided_slice %87 {offsets = [0, 0], sizes = [2, 32], strides = [1, 1]} : vector<2x128xf32> to vector<2x32xf32>
    %89 = arith.negf %88 : vector<2x32xf32>
    %90 = math.exp %89 : vector<2x32xf32>
    %cst_43 = arith.constant 1.000000e+00 : f32
    %91 = vector.broadcast %cst_43 : f32 to vector<2x32xf32>
    %92 = arith.addf %91, %90 : vector<2x32xf32>
    %93 = arith.divf %91, %92 : vector<2x32xf32>
    %94 = vector.extract_strided_slice %87 {offsets = [0, 32], sizes = [2, 32], strides = [1, 1]} : vector<2x128xf32> to vector<2x32xf32>
    %95 = arith.negf %94 : vector<2x32xf32>
    %96 = math.exp %95 : vector<2x32xf32>
    %cst_44 = arith.constant 1.000000e+00 : f32
    %97 = vector.broadcast %cst_44 : f32 to vector<2x32xf32>
    %98 = arith.addf %97, %96 : vector<2x32xf32>
    %99 = arith.divf %97, %98 : vector<2x32xf32>
    %100 = vector.extract_strided_slice %87 {offsets = [0, 64], sizes = [2, 32], strides = [1, 1]} : vector<2x128xf32> to vector<2x32xf32>
    %101 = math.tanh %100 : vector<2x32xf32>
    %102 = vector.extract_strided_slice %87 {offsets = [0, 96], sizes = [2, 32], strides = [1, 1]} : vector<2x128xf32> to vector<2x32xf32>
    %103 = arith.negf %102 : vector<2x32xf32>
    %104 = math.exp %103 : vector<2x32xf32>
    %cst_45 = arith.constant 1.000000e+00 : f32
    %105 = vector.broadcast %cst_45 : f32 to vector<2x32xf32>
    %106 = arith.addf %105, %104 : vector<2x32xf32>
    %107 = arith.divf %105, %106 : vector<2x32xf32>
    %108 = arith.mulf %99, %74 : vector<2x32xf32>
    %109 = arith.mulf %93, %101 : vector<2x32xf32>
    %110 = arith.addf %108, %109 : vector<2x32xf32>
    %111 = math.tanh %110 : vector<2x32xf32>
    %112 = arith.mulf %107, %111 : vector<2x32xf32>
    %c0_46 = arith.constant 0 : index
    %113 = arith.index_cast %82 : i32 to index
    %c0_47 = arith.constant 0 : index
    %c0_48 = arith.constant 0 : index
    %114 = vector.load %arg5[%c0_46, %113, %c0_47, %c0_48] : memref<1x8x2x32xf32, #tpu.memory_space<vmem>>, vector<1x1x2x32xf32>
    %115 = vector.shape_cast %114 : vector<1x1x2x32xf32> to vector<2x32xf32>
    %116 = vector.shape_cast %112 : vector<2x32xf32> to vector<1x1x2x32xf32>
    tpu.vector_store %arg5[%c0_46, %113, %c0_47, %c0_48], %116 {strides = array<i32>} : memref<1x8x2x32xf32, #tpu.memory_space<vmem>>, vector<1x1x2x32xf32>,
    %c2_i32 = arith.constant 2 : i32
    %c7_i32_49 = arith.constant 7 : i32
    %117 = arith.subi %c7_i32_49, %c2_i32 : i32
    %118 = arith.select %42, %117, %c2_i32 : i32
    %119 = arith.index_cast %118 : i32 to index
    %c0_50 = arith.constant 0 : index
    %c0_51 = arith.constant 0 : index
    %120 = vector.load %arg7[%119, %c0_50, %c0_51] : memref<8x2x128xf32, #tpu.memory_space<vmem>>, vector<1x2x128xf32>
    %121 = vector.shape_cast %120 : vector<1x2x128xf32> to vector<2x128xf32>
    %cst_52 = arith.constant dense<0.000000e+00> : vector<2x128xf32>
    %122 = tpu.matmul %112, %41, %cst_52 {dimension_numbers = #tpu.dot_dimension_numbers<[1], [0], [0], [1], [0, 0, 1, 1], [], []>} : vector<2x32xf32>, vector<32x128xf32>, vector<2x128xf32> -> vector<2x128xf32>
    %123 = arith.addf %121, %122 : vector<2x128xf32>
    %124 = vector.extract_strided_slice %123 {offsets = [0, 0], sizes = [2, 32], strides = [1, 1]} : vector<2x128xf32> to vector<2x32xf32>
    %125 = arith.negf %124 : vector<2x32xf32>
    %126 = math.exp %125 : vector<2x32xf32>
    %cst_53 = arith.constant 1.000000e+00 : f32
    %127 = vector.broadcast %cst_53 : f32 to vector<2x32xf32>
    %128 = arith.addf %127, %126 : vector<2x32xf32>
    %129 = arith.divf %127, %128 : vector<2x32xf32>
    %130 = vector.extract_strided_slice %123 {offsets = [0, 32], sizes = [2, 32], strides = [1, 1]} : vector<2x128xf32> to vector<2x32xf32>
    %131 = arith.negf %130 : vector<2x32xf32>
    %132 = math.exp %131 : vector<2x32xf32>
    %cst_54 = arith.constant 1.000000e+00 : f32
    %133 = vector.broadcast %cst_54 : f32 to vector<2x32xf32>
    %134 = arith.addf %133, %132 : vector<2x32xf32>
    %135 = arith.divf %133, %134 : vector<2x32xf32>
    %136 = vector.extract_strided_slice %123 {offsets = [0, 64], sizes = [2, 32], strides = [1, 1]} : vector<2x128xf32> to vector<2x32xf32>
    %137 = math.tanh %136 : vector<2x32xf32>
    %138 = vector.extract_strided_slice %123 {offsets = [0, 96], sizes = [2, 32], strides = [1, 1]} : vector<2x128xf32> to vector<2x32xf32>
    %139 = arith.negf %138 : vector<2x32xf32>
    %140 = math.exp %139 : vector<2x32xf32>
    %cst_55 = arith.constant 1.000000e+00 : f32
    %141 = vector.broadcast %cst_55 : f32 to vector<2x32xf32>
    %142 = arith.addf %141, %140 : vector<2x32xf32>
    %143 = arith.divf %141, %142 : vector<2x32xf32>
    %144 = arith.mulf %135, %110 : vector<2x32xf32>
    %145 = arith.mulf %129, %137 : vector<2x32xf32>
    %146 = arith.addf %144, %145 : vector<2x32xf32>
    %147 = math.tanh %146 : vector<2x32xf32>
    %148 = arith.mulf %143, %147 : vector<2x32xf32>
    %c0_56 = arith.constant 0 : index
    %149 = arith.index_cast %118 : i32 to index
    %c0_57 = arith.constant 0 : index
    %c0_58 = arith.constant 0 : index
    %150 = vector.load %arg5[%c0_56, %149, %c0_57, %c0_58] : memref<1x8x2x32xf32, #tpu.memory_space<vmem>>, vector<1x1x2x32xf32>
    %151 = vector.shape_cast %150 : vector<1x1x2x32xf32> to vector<2x32xf32>
    %152 = vector.shape_cast %148 : vector<2x32xf32> to vector<1x1x2x32xf32>
    tpu.vector_store %arg5[%c0_56, %149, %c0_57, %c0_58], %152 {strides = array<i32>} : memref<1x8x2x32xf32, #tpu.memory_space<vmem>>, vector<1x1x2x32xf32>,
    %c3_i32 = arith.constant 3 : i32
    %c7_i32_59 = arith.constant 7 : i32
    %153 = arith.subi %c7_i32_59, %c3_i32 : i32
    %154 = arith.select %42, %153, %c3_i32 : i32
    %155 = arith.index_cast %154 : i32 to index
    %c0_60 = arith.constant 0 : index
    %c0_61 = arith.constant 0 : index
    %156 = vector.load %arg7[%155, %c0_60, %c0_61] : memref<8x2x128xf32, #tpu.memory_space<vmem>>, vector<1x2x128xf32>
    %157 = vector.shape_cast %156 : vector<1x2x128xf32> to vector<2x128xf32>
    %cst_62 = arith.constant dense<0.000000e+00> : vector<2x128xf32>
    %158 = tpu.matmul %148, %41, %cst_62 {dimension_numbers = #tpu.dot_dimension_numbers<[1], [0], [0], [1], [0, 0, 1, 1], [], []>} : vector<2x32xf32>, vector<32x128xf32>, vector<2x128xf32> -> vector<2x128xf32>
    %159 = arith.addf %157, %158 : vector<2x128xf32>
    %160 = vector.extract_strided_slice %159 {offsets = [0, 0], sizes = [2, 32], strides = [1, 1]} : vector<2x128xf32> to vector<2x32xf32>
    %161 = arith.negf %160 : vector<2x32xf32>
    %162 = math.exp %161 : vector<2x32xf32>
    %cst_63 = arith.constant 1.000000e+00 : f32
    %163 = vector.broadcast %cst_63 : f32 to vector<2x32xf32>
    %164 = arith.addf %163, %162 : vector<2x32xf32>
    %165 = arith.divf %163, %164 : vector<2x32xf32>
    %166 = vector.extract_strided_slice %159 {offsets = [0, 32], sizes = [2, 32], strides = [1, 1]} : vector<2x128xf32> to vector<2x32xf32>
    %167 = arith.negf %166 : vector<2x32xf32>
    %168 = math.exp %167 : vector<2x32xf32>
    %cst_64 = arith.constant 1.000000e+00 : f32
    %169 = vector.broadcast %cst_64 : f32 to vector<2x32xf32>
    %170 = arith.addf %169, %168 : vector<2x32xf32>
    %171 = arith.divf %169, %170 : vector<2x32xf32>
    %172 = vector.extract_strided_slice %159 {offsets = [0, 64], sizes = [2, 32], strides = [1, 1]} : vector<2x128xf32> to vector<2x32xf32>
    %173 = math.tanh %172 : vector<2x32xf32>
    %174 = vector.extract_strided_slice %159 {offsets = [0, 96], sizes = [2, 32], strides = [1, 1]} : vector<2x128xf32> to vector<2x32xf32>
    %175 = arith.negf %174 : vector<2x32xf32>
    %176 = math.exp %175 : vector<2x32xf32>
    %cst_65 = arith.constant 1.000000e+00 : f32
    %177 = vector.broadcast %cst_65 : f32 to vector<2x32xf32>
    %178 = arith.addf %177, %176 : vector<2x32xf32>
    %179 = arith.divf %177, %178 : vector<2x32xf32>
    %180 = arith.mulf %171, %146 : vector<2x32xf32>
    %181 = arith.mulf %165, %173 : vector<2x32xf32>
    %182 = arith.addf %180, %181 : vector<2x32xf32>
    %183 = math.tanh %182 : vector<2x32xf32>
    %184 = arith.mulf %179, %183 : vector<2x32xf32>
    %c0_66 = arith.constant 0 : index
    %185 = arith.index_cast %154 : i32 to index
    %c0_67 = arith.constant 0 : index
    %c0_68 = arith.constant 0 : index
    %186 = vector.load %arg5[%c0_66, %185, %c0_67, %c0_68] : memref<1x8x2x32xf32, #tpu.memory_space<vmem>>, vector<1x1x2x32xf32>
    %187 = vector.shape_cast %186 : vector<1x1x2x32xf32> to vector<2x32xf32>
    %188 = vector.shape_cast %184 : vector<2x32xf32> to vector<1x1x2x32xf32>
    tpu.vector_store %arg5[%c0_66, %185, %c0_67, %c0_68], %188 {strides = array<i32>} : memref<1x8x2x32xf32, #tpu.memory_space<vmem>>, vector<1x1x2x32xf32>,
    %c4_i32 = arith.constant 4 : i32
    %c7_i32_69 = arith.constant 7 : i32
    %189 = arith.subi %c7_i32_69, %c4_i32 : i32
    %190 = arith.select %42, %189, %c4_i32 : i32
    %191 = arith.index_cast %190 : i32 to index
    %c0_70 = arith.constant 0 : index
    %c0_71 = arith.constant 0 : index
    %192 = vector.load %arg7[%191, %c0_70, %c0_71] : memref<8x2x128xf32, #tpu.memory_space<vmem>>, vector<1x2x128xf32>
    %193 = vector.shape_cast %192 : vector<1x2x128xf32> to vector<2x128xf32>
    %cst_72 = arith.constant dense<0.000000e+00> : vector<2x128xf32>
    %194 = tpu.matmul %184, %41, %cst_72 {dimension_numbers = #tpu.dot_dimension_numbers<[1], [0], [0], [1], [0, 0, 1, 1], [], []>} : vector<2x32xf32>, vector<32x128xf32>, vector<2x128xf32> -> vector<2x128xf32>
    %195 = arith.addf %193, %194 : vector<2x128xf32>
    %196 = vector.extract_strided_slice %195 {offsets = [0, 0], sizes = [2, 32], strides = [1, 1]} : vector<2x128xf32> to vector<2x32xf32>
    %197 = arith.negf %196 : vector<2x32xf32>
    %198 = math.exp %197 : vector<2x32xf32>
    %cst_73 = arith.constant 1.000000e+00 : f32
    %199 = vector.broadcast %cst_73 : f32 to vector<2x32xf32>
    %200 = arith.addf %199, %198 : vector<2x32xf32>
    %201 = arith.divf %199, %200 : vector<2x32xf32>
    %202 = vector.extract_strided_slice %195 {offsets = [0, 32], sizes = [2, 32], strides = [1, 1]} : vector<2x128xf32> to vector<2x32xf32>
    %203 = arith.negf %202 : vector<2x32xf32>
    %204 = math.exp %203 : vector<2x32xf32>
    %cst_74 = arith.constant 1.000000e+00 : f32
    %205 = vector.broadcast %cst_74 : f32 to vector<2x32xf32>
    %206 = arith.addf %205, %204 : vector<2x32xf32>
    %207 = arith.divf %205, %206 : vector<2x32xf32>
    %208 = vector.extract_strided_slice %195 {offsets = [0, 64], sizes = [2, 32], strides = [1, 1]} : vector<2x128xf32> to vector<2x32xf32>
    %209 = math.tanh %208 : vector<2x32xf32>
    %210 = vector.extract_strided_slice %195 {offsets = [0, 96], sizes = [2, 32], strides = [1, 1]} : vector<2x128xf32> to vector<2x32xf32>
    %211 = arith.negf %210 : vector<2x32xf32>
    %212 = math.exp %211 : vector<2x32xf32>
    %cst_75 = arith.constant 1.000000e+00 : f32
    %213 = vector.broadcast %cst_75 : f32 to vector<2x32xf32>
    %214 = arith.addf %213, %212 : vector<2x32xf32>
    %215 = arith.divf %213, %214 : vector<2x32xf32>
    %216 = arith.mulf %207, %182 : vector<2x32xf32>
    %217 = arith.mulf %201, %209 : vector<2x32xf32>
    %218 = arith.addf %216, %217 : vector<2x32xf32>
    %219 = math.tanh %218 : vector<2x32xf32>
    %220 = arith.mulf %215, %219 : vector<2x32xf32>
    %c0_76 = arith.constant 0 : index
    %221 = arith.index_cast %190 : i32 to index
    %c0_77 = arith.constant 0 : index
    %c0_78 = arith.constant 0 : index
    %222 = vector.load %arg5[%c0_76, %221, %c0_77, %c0_78] : memref<1x8x2x32xf32, #tpu.memory_space<vmem>>, vector<1x1x2x32xf32>
    %223 = vector.shape_cast %222 : vector<1x1x2x32xf32> to vector<2x32xf32>
    %224 = vector.shape_cast %220 : vector<2x32xf32> to vector<1x1x2x32xf32>
    tpu.vector_store %arg5[%c0_76, %221, %c0_77, %c0_78], %224 {strides = array<i32>} : memref<1x8x2x32xf32, #tpu.memory_space<vmem>>, vector<1x1x2x32xf32>,
    %c5_i32 = arith.constant 5 : i32
    %c7_i32_79 = arith.constant 7 : i32
    %225 = arith.subi %c7_i32_79, %c5_i32 : i32
    %226 = arith.select %42, %225, %c5_i32 : i32
    %227 = arith.index_cast %226 : i32 to index
    %c0_80 = arith.constant 0 : index
    %c0_81 = arith.constant 0 : index
    %228 = vector.load %arg7[%227, %c0_80, %c0_81] : memref<8x2x128xf32, #tpu.memory_space<vmem>>, vector<1x2x128xf32>
    %229 = vector.shape_cast %228 : vector<1x2x128xf32> to vector<2x128xf32>
    %cst_82 = arith.constant dense<0.000000e+00> : vector<2x128xf32>
    %230 = tpu.matmul %220, %41, %cst_82 {dimension_numbers = #tpu.dot_dimension_numbers<[1], [0], [0], [1], [0, 0, 1, 1], [], []>} : vector<2x32xf32>, vector<32x128xf32>, vector<2x128xf32> -> vector<2x128xf32>
    %231 = arith.addf %229, %230 : vector<2x128xf32>
    %232 = vector.extract_strided_slice %231 {offsets = [0, 0], sizes = [2, 32], strides = [1, 1]} : vector<2x128xf32> to vector<2x32xf32>
    %233 = arith.negf %232 : vector<2x32xf32>
    %234 = math.exp %233 : vector<2x32xf32>
    %cst_83 = arith.constant 1.000000e+00 : f32
    %235 = vector.broadcast %cst_83 : f32 to vector<2x32xf32>
    %236 = arith.addf %235, %234 : vector<2x32xf32>
    %237 = arith.divf %235, %236 : vector<2x32xf32>
    %238 = vector.extract_strided_slice %231 {offsets = [0, 32], sizes = [2, 32], strides = [1, 1]} : vector<2x128xf32> to vector<2x32xf32>
    %239 = arith.negf %238 : vector<2x32xf32>
    %240 = math.exp %239 : vector<2x32xf32>
    %cst_84 = arith.constant 1.000000e+00 : f32
    %241 = vector.broadcast %cst_84 : f32 to vector<2x32xf32>
    %242 = arith.addf %241, %240 : vector<2x32xf32>
    %243 = arith.divf %241, %242 : vector<2x32xf32>
    %244 = vector.extract_strided_slice %231 {offsets = [0, 64], sizes = [2, 32], strides = [1, 1]} : vector<2x128xf32> to vector<2x32xf32>
    %245 = math.tanh %244 : vector<2x32xf32>
    %246 = vector.extract_strided_slice %231 {offsets = [0, 96], sizes = [2, 32], strides = [1, 1]} : vector<2x128xf32> to vector<2x32xf32>
    %247 = arith.negf %246 : vector<2x32xf32>
    %248 = math.exp %247 : vector<2x32xf32>
    %cst_85 = arith.constant 1.000000e+00 : f32
    %249 = vector.broadcast %cst_85 : f32 to vector<2x32xf32>
    %250 = arith.addf %249, %248 : vector<2x32xf32>
    %251 = arith.divf %249, %250 : vector<2x32xf32>
    %252 = arith.mulf %243, %218 : vector<2x32xf32>
    %253 = arith.mulf %237, %245 : vector<2x32xf32>
    %254 = arith.addf %252, %253 : vector<2x32xf32>
    %255 = math.tanh %254 : vector<2x32xf32>
    %256 = arith.mulf %251, %255 : vector<2x32xf32>
    %c0_86 = arith.constant 0 : index
    %257 = arith.index_cast %226 : i32 to index
    %c0_87 = arith.constant 0 : index
    %c0_88 = arith.constant 0 : index
    %258 = vector.load %arg5[%c0_86, %257, %c0_87, %c0_88] : memref<1x8x2x32xf32, #tpu.memory_space<vmem>>, vector<1x1x2x32xf32>
    %259 = vector.shape_cast %258 : vector<1x1x2x32xf32> to vector<2x32xf32>
    %260 = vector.shape_cast %256 : vector<2x32xf32> to vector<1x1x2x32xf32>
    tpu.vector_store %arg5[%c0_86, %257, %c0_87, %c0_88], %260 {strides = array<i32>} : memref<1x8x2x32xf32, #tpu.memory_space<vmem>>, vector<1x1x2x32xf32>,
    %c6_i32 = arith.constant 6 : i32
    %c7_i32_89 = arith.constant 7 : i32
    %261 = arith.subi %c7_i32_89, %c6_i32 : i32
    %262 = arith.select %42, %261, %c6_i32 : i32
    %263 = arith.index_cast %262 : i32 to index
    %c0_90 = arith.constant 0 : index
    %c0_91 = arith.constant 0 : index
    %264 = vector.load %arg7[%263, %c0_90, %c0_91] : memref<8x2x128xf32, #tpu.memory_space<vmem>>, vector<1x2x128xf32>
    %265 = vector.shape_cast %264 : vector<1x2x128xf32> to vector<2x128xf32>
    %cst_92 = arith.constant dense<0.000000e+00> : vector<2x128xf32>
    %266 = tpu.matmul %256, %41, %cst_92 {dimension_numbers = #tpu.dot_dimension_numbers<[1], [0], [0], [1], [0, 0, 1, 1], [], []>} : vector<2x32xf32>, vector<32x128xf32>, vector<2x128xf32> -> vector<2x128xf32>
    %267 = arith.addf %265, %266 : vector<2x128xf32>
    %268 = vector.extract_strided_slice %267 {offsets = [0, 0], sizes = [2, 32], strides = [1, 1]} : vector<2x128xf32> to vector<2x32xf32>
    %269 = arith.negf %268 : vector<2x32xf32>
    %270 = math.exp %269 : vector<2x32xf32>
    %cst_93 = arith.constant 1.000000e+00 : f32
    %271 = vector.broadcast %cst_93 : f32 to vector<2x32xf32>
    %272 = arith.addf %271, %270 : vector<2x32xf32>
    %273 = arith.divf %271, %272 : vector<2x32xf32>
    %274 = vector.extract_strided_slice %267 {offsets = [0, 32], sizes = [2, 32], strides = [1, 1]} : vector<2x128xf32> to vector<2x32xf32>
    %275 = arith.negf %274 : vector<2x32xf32>
    %276 = math.exp %275 : vector<2x32xf32>
    %cst_94 = arith.constant 1.000000e+00 : f32
    %277 = vector.broadcast %cst_94 : f32 to vector<2x32xf32>
    %278 = arith.addf %277, %276 : vector<2x32xf32>
    %279 = arith.divf %277, %278 : vector<2x32xf32>
    %280 = vector.extract_strided_slice %267 {offsets = [0, 64], sizes = [2, 32], strides = [1, 1]} : vector<2x128xf32> to vector<2x32xf32>
    %281 = math.tanh %280 : vector<2x32xf32>
    %282 = vector.extract_strided_slice %267 {offsets = [0, 96], sizes = [2, 32], strides = [1, 1]} : vector<2x128xf32> to vector<2x32xf32>
    %283 = arith.negf %282 : vector<2x32xf32>
    %284 = math.exp %283 : vector<2x32xf32>
    %cst_95 = arith.constant 1.000000e+00 : f32
    %285 = vector.broadcast %cst_95 : f32 to vector<2x32xf32>
    %286 = arith.addf %285, %284 : vector<2x32xf32>
    %287 = arith.divf %285, %286 : vector<2x32xf32>
    %288 = arith.mulf %279, %254 : vector<2x32xf32>
    %289 = arith.mulf %273, %281 : vector<2x32xf32>
    %290 = arith.addf %288, %289 : vector<2x32xf32>
    %291 = math.tanh %290 : vector<2x32xf32>
    %292 = arith.mulf %287, %291 : vector<2x32xf32>
    %c0_96 = arith.constant 0 : index
    %293 = arith.index_cast %262 : i32 to index
    %c0_97 = arith.constant 0 : index
    %c0_98 = arith.constant 0 : index
    %294 = vector.load %arg5[%c0_96, %293, %c0_97, %c0_98] : memref<1x8x2x32xf32, #tpu.memory_space<vmem>>, vector<1x1x2x32xf32>
    %295 = vector.shape_cast %294 : vector<1x1x2x32xf32> to vector<2x32xf32>
    %296 = vector.shape_cast %292 : vector<2x32xf32> to vector<1x1x2x32xf32>
    tpu.vector_store %arg5[%c0_96, %293, %c0_97, %c0_98], %296 {strides = array<i32>} : memref<1x8x2x32xf32, #tpu.memory_space<vmem>>, vector<1x1x2x32xf32>,
    %c7_i32_99 = arith.constant 7 : i32
    %c7_i32_100 = arith.constant 7 : i32
    %297 = arith.subi %c7_i32_100, %c7_i32_99 : i32
    %298 = arith.select %42, %297, %c7_i32_99 : i32
    %299 = arith.index_cast %298 : i32 to index
    %c0_101 = arith.constant 0 : index
    %c0_102 = arith.constant 0 : index
    %300 = vector.load %arg7[%299, %c0_101, %c0_102] : memref<8x2x128xf32, #tpu.memory_space<vmem>>, vector<1x2x128xf32>
    %301 = vector.shape_cast %300 : vector<1x2x128xf32> to vector<2x128xf32>
    %cst_103 = arith.constant dense<0.000000e+00> : vector<2x128xf32>
    %302 = tpu.matmul %292, %41, %cst_103 {dimension_numbers = #tpu.dot_dimension_numbers<[1], [0], [0], [1], [0, 0, 1, 1], [], []>} : vector<2x32xf32>, vector<32x128xf32>, vector<2x128xf32> -> vector<2x128xf32>
    %303 = arith.addf %301, %302 : vector<2x128xf32>
    %304 = vector.extract_strided_slice %303 {offsets = [0, 0], sizes = [2, 32], strides = [1, 1]} : vector<2x128xf32> to vector<2x32xf32>
    %305 = arith.negf %304 : vector<2x32xf32>
    %306 = math.exp %305 : vector<2x32xf32>
    %cst_104 = arith.constant 1.000000e+00 : f32
    %307 = vector.broadcast %cst_104 : f32 to vector<2x32xf32>
    %308 = arith.addf %307, %306 : vector<2x32xf32>
    %309 = arith.divf %307, %308 : vector<2x32xf32>
    %310 = vector.extract_strided_slice %303 {offsets = [0, 32], sizes = [2, 32], strides = [1, 1]} : vector<2x128xf32> to vector<2x32xf32>
    %311 = arith.negf %310 : vector<2x32xf32>
    %312 = math.exp %311 : vector<2x32xf32>
    %cst_105 = arith.constant 1.000000e+00 : f32
    %313 = vector.broadcast %cst_105 : f32 to vector<2x32xf32>
    %314 = arith.addf %313, %312 : vector<2x32xf32>
    %315 = arith.divf %313, %314 : vector<2x32xf32>
    %316 = vector.extract_strided_slice %303 {offsets = [0, 64], sizes = [2, 32], strides = [1, 1]} : vector<2x128xf32> to vector<2x32xf32>
    %317 = math.tanh %316 : vector<2x32xf32>
    %318 = vector.extract_strided_slice %303 {offsets = [0, 96], sizes = [2, 32], strides = [1, 1]} : vector<2x128xf32> to vector<2x32xf32>
    %319 = arith.negf %318 : vector<2x32xf32>
    %320 = math.exp %319 : vector<2x32xf32>
    %cst_106 = arith.constant 1.000000e+00 : f32
    %321 = vector.broadcast %cst_106 : f32 to vector<2x32xf32>
    %322 = arith.addf %321, %320 : vector<2x32xf32>
    %323 = arith.divf %321, %322 : vector<2x32xf32>
    %324 = arith.mulf %315, %290 : vector<2x32xf32>
    %325 = arith.mulf %309, %317 : vector<2x32xf32>
    %326 = arith.addf %324, %325 : vector<2x32xf32>
    %327 = math.tanh %326 : vector<2x32xf32>
    %328 = arith.mulf %323, %327 : vector<2x32xf32>
    %c0_107 = arith.constant 0 : index
    %329 = arith.index_cast %298 : i32 to index
    %c0_108 = arith.constant 0 : index
    %c0_109 = arith.constant 0 : index
    %330 = vector.load %arg5[%c0_107, %329, %c0_108, %c0_109] : memref<1x8x2x32xf32, #tpu.memory_space<vmem>>, vector<1x1x2x32xf32>
    %331 = vector.shape_cast %330 : vector<1x1x2x32xf32> to vector<2x32xf32>
    %332 = vector.shape_cast %328 : vector<2x32xf32> to vector<1x1x2x32xf32>
    tpu.vector_store %arg5[%c0_107, %329, %c0_108, %c0_109], %332 {strides = array<i32>} : memref<1x8x2x32xf32, #tpu.memory_space<vmem>>, vector<1x1x2x32xf32>,
    %c8_i32 = arith.constant 8 : i32
    %c0_110 = arith.constant 0 : index
    %c0_111 = arith.constant 0 : index
    %c0_112 = arith.constant 0 : index
    %333 = vector.load %arg6[%c0_110, %c0_111, %c0_112] : memref<1x2x32xf32, #tpu.memory_space<vmem>>, vector<1x2x32xf32>
    %334 = vector.shape_cast %333 : vector<1x2x32xf32> to vector<2x32xf32>
    %335 = vector.shape_cast %328 : vector<2x32xf32> to vector<1x2x32xf32>
    tpu.vector_store %arg6[%c0_110, %c0_111, %c0_112], %335 {strides = array<i32>} : memref<1x2x32xf32, #tpu.memory_space<vmem>>, vector<1x2x32xf32>,
    return
  }
  func.func @transform_0(%arg0: i32) -> (i32, i32) {
    %c0_i32 = arith.constant 0 : i32
    %c0_i32_0 = arith.constant 0 : i32
    %c0_i32_1 = arith.constant 0 : i32
    return %c0_i32, %c0_i32_0 : i32, i32
  }
  func.func @transform_1(%arg0: i32) -> (i32, i32, i32) {
    %c0_i32 = arith.constant 0 : i32
    %c0_i32_0 = arith.constant 0 : i32
    %c0_i32_1 = arith.constant 0 : i32
    return %arg0, %c0_i32, %c0_i32_0 : i32, i32, i32
  }
  func.func @transform_2(%arg0: i32) -> (i32, i32, i32) {
    %c0_i32 = arith.constant 0 : i32
    %c0_i32_0 = arith.constant 0 : i32
    %c0_i32_1 = arith.constant 0 : i32
    return %arg0, %c0_i32, %c0_i32_0 : i32, i32, i32
  }
  func.func @transform_3(%arg0: i32) -> (i32, i32, i32) {
    %c0_i32 = arith.constant 0 : i32
    %c0_i32_0 = arith.constant 0 : i32
    %c0_i32_1 = arith.constant 0 : i32
    return %arg0, %c0_i32, %c0_i32_0 : i32, i32, i32
  }
  func.func @transform_4(%arg0: i32) -> (i32, i32, i32, i32) {
    %c0_i32 = arith.constant 0 : i32
    %c0_i32_0 = arith.constant 0 : i32
    %c0_i32_1 = arith.constant 0 : i32
    %c0_i32_2 = arith.constant 0 : i32
    return %arg0, %c0_i32, %c0_i32_0, %c0_i32_1 : i32, i32, i32, i32
  }
  func.func @transform_5(%arg0: i32) -> (i32, i32, i32) {
    %c0_i32 = arith.constant 0 : i32
    %c0_i32_0 = arith.constant 0 : i32
    %c0_i32_1 = arith.constant 0 : i32
    return %arg0, %c0_i32, %c0_i32_0 : i32, i32, i32
  }
}

module attributes {stable_mosaic.version = 11 : i64} {
  func.func @_bilstm_dir_kernel(%arg0: i32, %arg1: memref<16x64xf32, #tpu.memory_space<vmem>>, %arg2: memref<1x64x128xf32, #tpu.memory_space<vmem>>, %arg3: memref<1x32x128xf32, #tpu.memory_space<vmem>>, %arg4: memref<1x1x128xf32, #tpu.memory_space<vmem>>, %arg5: memref<1x8x2x32xf32, #tpu.memory_space<vmem>>, %arg6: memref<1x2x32xf32, #tpu.memory_space<vmem>>, %arg7: memref<8x2x128xf32, #tpu.memory_space<vmem>>) attributes {dimension_semantics = [#tpu.dimension_semantics<parallel>], iteration_bounds = array<i64: 2>, scalar_prefetch = 0 : i64, scratch_operands = 1 : i64, tpu.core_type = #tpu.core_type<tc>, window_params = [{pipeline_mode = #tpu.pipeline_mode<synchronous>, transform_indices = @transform_0, window_bounds = array<i64: 16, 64>}, {transform_indices = @transform_1, window_bounds = array<i64: 1, 64, 128>}, {transform_indices = @transform_2, window_bounds = array<i64: 1, 32, 128>}, {transform_indices = @transform_3, window_bounds = array<i64: 1, 1, 128>}, {transform_indices = @transform_4, window_bounds = array<i64: 1, 8, 2, 32>}, {transform_indices = @transform_5, window_bounds = array<i64: 1, 2, 32>}]} {
    %c0 = arith.constant 0 : index
    %c0_0 = arith.constant 0 : index
    %0 = vector.load %arg1[%c0, %c0_0] : memref<16x64xf32, #tpu.memory_space<vmem>>, vector<16x64xf32>
    %c0_1 = arith.constant 0 : index
    %c0_2 = arith.constant 0 : index
    %c0_3 = arith.constant 0 : index
    %1 = vector.load %arg2[%c0_1, %c0_2, %c0_3] : memref<1x64x128xf32, #tpu.memory_space<vmem>>, vector<1x64x128xf32>
    %2 = vector.shape_cast %1 : vector<1x64x128xf32> to vector<64x128xf32>
    %cst = arith.constant dense<0.000000e+00> : vector<16x128xf32>
    %3 = tpu.matmul %0, %2, %cst {dimension_numbers = #tpu.dot_dimension_numbers<[1], [0], [0], [1], [0, 0, 1, 1], [], []>} : vector<16x64xf32>, vector<64x128xf32>, vector<16x128xf32> -> vector<16x128xf32>
    %c0_4 = arith.constant 0 : index
    %c0_5 = arith.constant 0 : index
    %c0_6 = arith.constant 0 : index
    %4 = vector.load %arg4[%c0_4, %c0_5, %c0_6] : memref<1x1x128xf32, #tpu.memory_space<vmem>>, vector<1x1x128xf32>
    %5 = vector.shape_cast %4 : vector<1x1x128xf32> to vector<1x128xf32>
    %6 = vector.broadcast %5 : vector<1x128xf32> to vector<16x128xf32>
    %7 = arith.addf %3, %6 : vector<16x128xf32>
    %8 = vector.extract_strided_slice %7 {offsets = [0, 0], sizes = [2, 128], strides = [1, 1]} : vector<16x128xf32> to vector<2x128xf32>
    %c0_7 = arith.constant 0 : index
    %c0_8 = arith.constant 0 : index
    %c0_9 = arith.constant 0 : index
    %9 = vector.load %arg7[%c0_7, %c0_8, %c0_9] : memref<8x2x128xf32, #tpu.memory_space<vmem>>, vector<1x2x128xf32>
    %10 = vector.shape_cast %9 : vector<1x2x128xf32> to vector<2x128xf32>
    %11 = vector.shape_cast %8 : vector<2x128xf32> to vector<1x2x128xf32>
    tpu.vector_store %arg7[%c0_7, %c0_8, %c0_9], %11 {strides = array<i32>} : memref<8x2x128xf32, #tpu.memory_space<vmem>>, vector<1x2x128xf32>,
    %12 = vector.extract_strided_slice %7 {offsets = [2, 0], sizes = [2, 128], strides = [1, 1]} : vector<16x128xf32> to vector<2x128xf32>
    %c1 = arith.constant 1 : index
    %c0_10 = arith.constant 0 : index
    %c0_11 = arith.constant 0 : index
    %13 = vector.load %arg7[%c1, %c0_10, %c0_11] : memref<8x2x128xf32, #tpu.memory_space<vmem>>, vector<1x2x128xf32>
    %14 = vector.shape_cast %13 : vector<1x2x128xf32> to vector<2x128xf32>
    %15 = vector.shape_cast %12 : vector<2x128xf32> to vector<1x2x128xf32>
    tpu.vector_store %arg7[%c1, %c0_10, %c0_11], %15 {strides = array<i32>} : memref<8x2x128xf32, #tpu.memory_space<vmem>>, vector<1x2x128xf32>,
    %16 = vector.extract_strided_slice %7 {offsets = [4, 0], sizes = [2, 128], strides = [1, 1]} : vector<16x128xf32> to vector<2x128xf32>
    %c2 = arith.constant 2 : index
    %c0_12 = arith.constant 0 : index
    %c0_13 = arith.constant 0 : index
    %17 = vector.load %arg7[%c2, %c0_12, %c0_13] : memref<8x2x128xf32, #tpu.memory_space<vmem>>, vector<1x2x128xf32>
    %18 = vector.shape_cast %17 : vector<1x2x128xf32> to vector<2x128xf32>
    %19 = vector.shape_cast %16 : vector<2x128xf32> to vector<1x2x128xf32>
    tpu.vector_store %arg7[%c2, %c0_12, %c0_13], %19 {strides = array<i32>} : memref<8x2x128xf32, #tpu.memory_space<vmem>>, vector<1x2x128xf32>,
    %20 = vector.extract_strided_slice %7 {offsets = [6, 0], sizes = [2, 128], strides = [1, 1]} : vector<16x128xf32> to vector<2x128xf32>
    %c3 = arith.constant 3 : index
    %c0_14 = arith.constant 0 : index
    %c0_15 = arith.constant 0 : index
    %21 = vector.load %arg7[%c3, %c0_14, %c0_15] : memref<8x2x128xf32, #tpu.memory_space<vmem>>, vector<1x2x128xf32>
    %22 = vector.shape_cast %21 : vector<1x2x128xf32> to vector<2x128xf32>
    %23 = vector.shape_cast %20 : vector<2x128xf32> to vector<1x2x128xf32>
    tpu.vector_store %arg7[%c3, %c0_14, %c0_15], %23 {strides = array<i32>} : memref<8x2x128xf32, #tpu.memory_space<vmem>>, vector<1x2x128xf32>,
    %24 = vector.extract_strided_slice %7 {offsets = [8, 0], sizes = [2, 128], strides = [1, 1]} : vector<16x128xf32> to vector<2x128xf32>
    %c4 = arith.constant 4 : index
    %c0_16 = arith.constant 0 : index
    %c0_17 = arith.constant 0 : index
    %25 = vector.load %arg7[%c4, %c0_16, %c0_17] : memref<8x2x128xf32, #tpu.memory_space<vmem>>, vector<1x2x128xf32>
    %26 = vector.shape_cast %25 : vector<1x2x128xf32> to vector<2x128xf32>
    %27 = vector.shape_cast %24 : vector<2x128xf32> to vector<1x2x128xf32>
    tpu.vector_store %arg7[%c4, %c0_16, %c0_17], %27 {strides = array<i32>} : memref<8x2x128xf32, #tpu.memory_space<vmem>>, vector<1x2x128xf32>,
    %28 = vector.extract_strided_slice %7 {offsets = [10, 0], sizes = [2, 128], strides = [1, 1]} : vector<16x128xf32> to vector<2x128xf32>
    %c5 = arith.constant 5 : index
    %c0_18 = arith.constant 0 : index
    %c0_19 = arith.constant 0 : index
    %29 = vector.load %arg7[%c5, %c0_18, %c0_19] : memref<8x2x128xf32, #tpu.memory_space<vmem>>, vector<1x2x128xf32>
    %30 = vector.shape_cast %29 : vector<1x2x128xf32> to vector<2x128xf32>
    %31 = vector.shape_cast %28 : vector<2x128xf32> to vector<1x2x128xf32>
    tpu.vector_store %arg7[%c5, %c0_18, %c0_19], %31 {strides = array<i32>} : memref<8x2x128xf32, #tpu.memory_space<vmem>>, vector<1x2x128xf32>,
    %32 = vector.extract_strided_slice %7 {offsets = [12, 0], sizes = [2, 128], strides = [1, 1]} : vector<16x128xf32> to vector<2x128xf32>
    %c6 = arith.constant 6 : index
    %c0_20 = arith.constant 0 : index
    %c0_21 = arith.constant 0 : index
    %33 = vector.load %arg7[%c6, %c0_20, %c0_21] : memref<8x2x128xf32, #tpu.memory_space<vmem>>, vector<1x2x128xf32>
    %34 = vector.shape_cast %33 : vector<1x2x128xf32> to vector<2x128xf32>
    %35 = vector.shape_cast %32 : vector<2x128xf32> to vector<1x2x128xf32>
    tpu.vector_store %arg7[%c6, %c0_20, %c0_21], %35 {strides = array<i32>} : memref<8x2x128xf32, #tpu.memory_space<vmem>>, vector<1x2x128xf32>,
    %36 = vector.extract_strided_slice %7 {offsets = [14, 0], sizes = [2, 128], strides = [1, 1]} : vector<16x128xf32> to vector<2x128xf32>
    %c7 = arith.constant 7 : index
    %c0_22 = arith.constant 0 : index
    %c0_23 = arith.constant 0 : index
    %37 = vector.load %arg7[%c7, %c0_22, %c0_23] : memref<8x2x128xf32, #tpu.memory_space<vmem>>, vector<1x2x128xf32>
    %38 = vector.shape_cast %37 : vector<1x2x128xf32> to vector<2x128xf32>
    %39 = vector.shape_cast %36 : vector<2x128xf32> to vector<1x2x128xf32>
    tpu.vector_store %arg7[%c7, %c0_22, %c0_23], %39 {strides = array<i32>} : memref<8x2x128xf32, #tpu.memory_space<vmem>>, vector<1x2x128xf32>,
    %c0_24 = arith.constant 0 : index
    %c0_25 = arith.constant 0 : index
    %c0_26 = arith.constant 0 : index
    %40 = vector.load %arg3[%c0_24, %c0_25, %c0_26] : memref<1x32x128xf32, #tpu.memory_space<vmem>>, vector<1x32x128xf32>
    %41 = vector.shape_cast %40 : vector<1x32x128xf32> to vector<32x128xf32>
    %c1_i32 = arith.constant 1 : i32
    %42 = arith.cmpi eq, %arg0, %c1_i32 : i32
    %cst_27 = arith.constant 0.000000e+00 : f32
    %43 = vector.broadcast %cst_27 : f32 to vector<2x32xf32>
    %cst_28 = arith.constant 0.000000e+00 : f32
    %44 = vector.broadcast %cst_28 : f32 to vector<2x32xf32>
    %c0_i32 = arith.constant 0 : i32
    %c7_i32 = arith.constant 7 : i32
    %45 = arith.subi %c7_i32, %c0_i32 : i32
    %46 = arith.select %42, %45, %c0_i32 : i32
    %47 = arith.index_cast %46 : i32 to index
    %c0_29 = arith.constant 0 : index
    %c0_30 = arith.constant 0 : index
    %48 = vector.load %arg7[%47, %c0_29, %c0_30] : memref<8x2x128xf32, #tpu.memory_space<vmem>>, vector<1x2x128xf32>
    %49 = vector.shape_cast %48 : vector<1x2x128xf32> to vector<2x128xf32>
    %cst_31 = arith.constant dense<0.000000e+00> : vector<2x128xf32>
    %50 = tpu.matmul %43, %41, %cst_31 {dimension_numbers = #tpu.dot_dimension_numbers<[1], [0], [0], [1], [0, 0, 1, 1], [], []>} : vector<2x32xf32>, vector<32x128xf32>, vector<2x128xf32> -> vector<2x128xf32>
    %51 = arith.addf %49, %50 : vector<2x128xf32>
    %52 = vector.extract_strided_slice %51 {offsets = [0, 0], sizes = [2, 32], strides = [1, 1]} : vector<2x128xf32> to vector<2x32xf32>
    %53 = arith.negf %52 : vector<2x32xf32>
    %54 = math.exp %53 : vector<2x32xf32>
    %cst_32 = arith.constant 1.000000e+00 : f32
    %55 = vector.broadcast %cst_32 : f32 to vector<2x32xf32>
    %56 = arith.addf %55, %54 : vector<2x32xf32>
    %57 = arith.divf %55, %56 : vector<2x32xf32>
    %58 = vector.extract_strided_slice %51 {offsets = [0, 32], sizes = [2, 32], strides = [1, 1]} : vector<2x128xf32> to vector<2x32xf32>
    %59 = arith.negf %58 : vector<2x32xf32>
    %60 = math.exp %59 : vector<2x32xf32>
    %cst_33 = arith.constant 1.000000e+00 : f32
    %61 = vector.broadcast %cst_33 : f32 to vector<2x32xf32>
    %62 = arith.addf %61, %60 : vector<2x32xf32>
    %63 = arith.divf %61, %62 : vector<2x32xf32>
    %64 = vector.extract_strided_slice %51 {offsets = [0, 64], sizes = [2, 32], strides = [1, 1]} : vector<2x128xf32> to vector<2x32xf32>
    %65 = math.tanh %64 : vector<2x32xf32>
    %66 = vector.extract_strided_slice %51 {offsets = [0, 96], sizes = [2, 32], strides = [1, 1]} : vector<2x128xf32> to vector<2x32xf32>
    %67 = arith.negf %66 : vector<2x32xf32>
    %68 = math.exp %67 : vector<2x32xf32>
    %cst_34 = arith.constant 1.000000e+00 : f32
    %69 = vector.broadcast %cst_34 : f32 to vector<2x32xf32>
    %70 = arith.addf %69, %68 : vector<2x32xf32>
    %71 = arith.divf %69, %70 : vector<2x32xf32>
    %72 = arith.mulf %63, %44 : vector<2x32xf32>
    %73 = arith.mulf %57, %65 : vector<2x32xf32>
    %74 = arith.addf %72, %73 : vector<2x32xf32>
    %75 = math.tanh %74 : vector<2x32xf32>
    %76 = arith.mulf %71, %75 : vector<2x32xf32>
    %c0_35 = arith.constant 0 : index
    %77 = arith.index_cast %46 : i32 to index
    %c0_36 = arith.constant 0 : index
    %c0_37 = arith.constant 0 : index
    %78 = vector.load %arg5[%c0_35, %77, %c0_36, %c0_37] : memref<1x8x2x32xf32, #tpu.memory_space<vmem>>, vector<1x1x2x32xf32>
    %79 = vector.shape_cast %78 : vector<1x1x2x32xf32> to vector<2x32xf32>
    %80 = vector.shape_cast %76 : vector<2x32xf32> to vector<1x1x2x32xf32>
    tpu.vector_store %arg5[%c0_35, %77, %c0_36, %c0_37], %80 {strides = array<i32>} : memref<1x8x2x32xf32, #tpu.memory_space<vmem>>, vector<1x1x2x32xf32>,
    %c1_i32_38 = arith.constant 1 : i32
    %c7_i32_39 = arith.constant 7 : i32
    %81 = arith.subi %c7_i32_39, %c1_i32_38 : i32
    %82 = arith.select %42, %81, %c1_i32_38 : i32
    %83 = arith.index_cast %82 : i32 to index
    %c0_40 = arith.constant 0 : index
    %c0_41 = arith.constant 0 : index
    %84 = vector.load %arg7[%83, %c0_40, %c0_41] : memref<8x2x128xf32, #tpu.memory_space<vmem>>, vector<1x2x128xf32>
    %85 = vector.shape_cast %84 : vector<1x2x128xf32> to vector<2x128xf32>
    %cst_42 = arith.constant dense<0.000000e+00> : vector<2x128xf32>
    %86 = tpu.matmul %76, %41, %cst_42 {dimension_numbers = #tpu.dot_dimension_numbers<[1], [0], [0], [1], [0, 0, 1, 1], [], []>} : vector<2x32xf32>, vector<32x128xf32>, vector<2x128xf32> -> vector<2x128xf32>
    %87 = arith.addf %85, %86 : vector<2x128xf32>
    %88 = vector.extract_strided_slice %87 {offsets = [0, 0], sizes = [2, 32], strides = [1, 1]} : vector<2x128xf32> to vector<2x32xf32>
    %89 = arith.negf %88 : vector<2x32xf32>
    %90 = math.exp %89 : vector<2x32xf32>
    %cst_43 = arith.constant 1.000000e+00 : f32
    %91 = vector.broadcast %cst_43 : f32 to vector<2x32xf32>
    %92 = arith.addf %91, %90 : vector<2x32xf32>
    %93 = arith.divf %91, %92 : vector<2x32xf32>
    %94 = vector.extract_strided_slice %87 {offsets = [0, 32], sizes = [2, 32], strides = [1, 1]} : vector<2x128xf32> to vector<2x32xf32>
    %95 = arith.negf %94 : vector<2x32xf32>
    %96 = math.exp %95 : vector<2x32xf32>
    %cst_44 = arith.constant 1.000000e+00 : f32
    %97 = vector.broadcast %cst_44 : f32 to vector<2x32xf32>
    %98 = arith.addf %97, %96 : vector<2x32xf32>
    %99 = arith.divf %97, %98 : vector<2x32xf32>
    %100 = vector.extract_strided_slice %87 {offsets = [0, 64], sizes = [2, 32], strides = [1, 1]} : vector<2x128xf32> to vector<2x32xf32>
    %101 = math.tanh %100 : vector<2x32xf32>
    %102 = vector.extract_strided_slice %87 {offsets = [0, 96], sizes = [2, 32], strides = [1, 1]} : vector<2x128xf32> to vector<2x32xf32>
    %103 = arith.negf %102 : vector<2x32xf32>
    %104 = math.exp %103 : vector<2x32xf32>
    %cst_45 = arith.constant 1.000000e+00 : f32
    %105 = vector.broadcast %cst_45 : f32 to vector<2x32xf32>
    %106 = arith.addf %105, %104 : vector<2x32xf32>
    %107 = arith.divf %105, %106 : vector<2x32xf32>
    %108 = arith.mulf %99, %74 : vector<2x32xf32>
    %109 = arith.mulf %93, %101 : vector<2x32xf32>
    %110 = arith.addf %108, %109 : vector<2x32xf32>
    %111 = math.tanh %110 : vector<2x32xf32>
    %112 = arith.mulf %107, %111 : vector<2x32xf32>
    %c0_46 = arith.constant 0 : index
    %113 = arith.index_cast %82 : i32 to index
    %c0_47 = arith.constant 0 : index
    %c0_48 = arith.constant 0 : index
    %114 = vector.load %arg5[%c0_46, %113, %c0_47, %c0_48] : memref<1x8x2x32xf32, #tpu.memory_space<vmem>>, vector<1x1x2x32xf32>
    %115 = vector.shape_cast %114 : vector<1x1x2x32xf32> to vector<2x32xf32>
    %116 = vector.shape_cast %112 : vector<2x32xf32> to vector<1x1x2x32xf32>
    tpu.vector_store %arg5[%c0_46, %113, %c0_47, %c0_48], %116 {strides = array<i32>} : memref<1x8x2x32xf32, #tpu.memory_space<vmem>>, vector<1x1x2x32xf32>,
    %c2_i32 = arith.constant 2 : i32
    %c7_i32_49 = arith.constant 7 : i32
    %117 = arith.subi %c7_i32_49, %c2_i32 : i32
    %118 = arith.select %42, %117, %c2_i32 : i32
    %119 = arith.index_cast %118 : i32 to index
    %c0_50 = arith.constant 0 : index
    %c0_51 = arith.constant 0 : index
    %120 = vector.load %arg7[%119, %c0_50, %c0_51] : memref<8x2x128xf32, #tpu.memory_space<vmem>>, vector<1x2x128xf32>
    %121 = vector.shape_cast %120 : vector<1x2x128xf32> to vector<2x128xf32>
    %cst_52 = arith.constant dense<0.000000e+00> : vector<2x128xf32>
    %122 = tpu.matmul %112, %41, %cst_52 {dimension_numbers = #tpu.dot_dimension_numbers<[1], [0], [0], [1], [0, 0, 1, 1], [], []>} : vector<2x32xf32>, vector<32x128xf32>, vector<2x128xf32> -> vector<2x128xf32>
    %123 = arith.addf %121, %122 : vector<2x128xf32>
    %124 = vector.extract_strided_slice %123 {offsets = [0, 0], sizes = [2, 32], strides = [1, 1]} : vector<2x128xf32> to vector<2x32xf32>
    %125 = arith.negf %124 : vector<2x32xf32>
    %126 = math.exp %125 : vector<2x32xf32>
    %cst_53 = arith.constant 1.000000e+00 : f32
    %127 = vector.broadcast %cst_53 : f32 to vector<2x32xf32>
    %128 = arith.addf %127, %126 : vector<2x32xf32>
    %129 = arith.divf %127, %128 : vector<2x32xf32>
    %130 = vector.extract_strided_slice %123 {offsets = [0, 32], sizes = [2, 32], strides = [1, 1]} : vector<2x128xf32> to vector<2x32xf32>
    %131 = arith.negf %130 : vector<2x32xf32>
    %132 = math.exp %131 : vector<2x32xf32>
    %cst_54 = arith.constant 1.000000e+00 : f32
    %133 = vector.broadcast %cst_54 : f32 to vector<2x32xf32>
    %134 = arith.addf %133, %132 : vector<2x32xf32>
    %135 = arith.divf %133, %134 : vector<2x32xf32>
    %136 = vector.extract_strided_slice %123 {offsets = [0, 64], sizes = [2, 32], strides = [1, 1]} : vector<2x128xf32> to vector<2x32xf32>
    %137 = math.tanh %136 : vector<2x32xf32>
    %138 = vector.extract_strided_slice %123 {offsets = [0, 96], sizes = [2, 32], strides = [1, 1]} : vector<2x128xf32> to vector<2x32xf32>
    %139 = arith.negf %138 : vector<2x32xf32>
    %140 = math.exp %139 : vector<2x32xf32>
    %cst_55 = arith.constant 1.000000e+00 : f32
    %141 = vector.broadcast %cst_55 : f32 to vector<2x32xf32>
    %142 = arith.addf %141, %140 : vector<2x32xf32>
    %143 = arith.divf %141, %142 : vector<2x32xf32>
    %144 = arith.mulf %135, %110 : vector<2x32xf32>
    %145 = arith.mulf %129, %137 : vector<2x32xf32>
    %146 = arith.addf %144, %145 : vector<2x32xf32>
    %147 = math.tanh %146 : vector<2x32xf32>
    %148 = arith.mulf %143, %147 : vector<2x32xf32>
    %c0_56 = arith.constant 0 : index
    %149 = arith.index_cast %118 : i32 to index
    %c0_57 = arith.constant 0 : index
    %c0_58 = arith.constant 0 : index
    %150 = vector.load %arg5[%c0_56, %149, %c0_57, %c0_58] : memref<1x8x2x32xf32, #tpu.memory_space<vmem>>, vector<1x1x2x32xf32>
    %151 = vector.shape_cast %150 : vector<1x1x2x32xf32> to vector<2x32xf32>
    %152 = vector.shape_cast %148 : vector<2x32xf32> to vector<1x1x2x32xf32>
    tpu.vector_store %arg5[%c0_56, %149, %c0_57, %c0_58], %152 {strides = array<i32>} : memref<1x8x2x32xf32, #tpu.memory_space<vmem>>, vector<1x1x2x32xf32>,
    %c3_i32 = arith.constant 3 : i32
    %c7_i32_59 = arith.constant 7 : i32
    %153 = arith.subi %c7_i32_59, %c3_i32 : i32
    %154 = arith.select %42, %153, %c3_i32 : i32
    %155 = arith.index_cast %154 : i32 to index
    %c0_60 = arith.constant 0 : index
    %c0_61 = arith.constant 0 : index
    %156 = vector.load %arg7[%155, %c0_60, %c0_61] : memref<8x2x128xf32, #tpu.memory_space<vmem>>, vector<1x2x128xf32>
    %157 = vector.shape_cast %156 : vector<1x2x128xf32> to vector<2x128xf32>
    %cst_62 = arith.constant dense<0.000000e+00> : vector<2x128xf32>
    %158 = tpu.matmul %148, %41, %cst_62 {dimension_numbers = #tpu.dot_dimension_numbers<[1], [0], [0], [1], [0, 0, 1, 1], [], []>} : vector<2x32xf32>, vector<32x128xf32>, vector<2x128xf32> -> vector<2x128xf32>
    %159 = arith.addf %157, %158 : vector<2x128xf32>
    %160 = vector.extract_strided_slice %159 {offsets = [0, 0], sizes = [2, 32], strides = [1, 1]} : vector<2x128xf32> to vector<2x32xf32>
    %161 = arith.negf %160 : vector<2x32xf32>
    %162 = math.exp %161 : vector<2x32xf32>
    %cst_63 = arith.constant 1.000000e+00 : f32
    %163 = vector.broadcast %cst_63 : f32 to vector<2x32xf32>
    %164 = arith.addf %163, %162 : vector<2x32xf32>
    %165 = arith.divf %163, %164 : vector<2x32xf32>
    %166 = vector.extract_strided_slice %159 {offsets = [0, 32], sizes = [2, 32], strides = [1, 1]} : vector<2x128xf32> to vector<2x32xf32>
    %167 = arith.negf %166 : vector<2x32xf32>
    %168 = math.exp %167 : vector<2x32xf32>
    %cst_64 = arith.constant 1.000000e+00 : f32
    %169 = vector.broadcast %cst_64 : f32 to vector<2x32xf32>
    %170 = arith.addf %169, %168 : vector<2x32xf32>
    %171 = arith.divf %169, %170 : vector<2x32xf32>
    %172 = vector.extract_strided_slice %159 {offsets = [0, 64], sizes = [2, 32], strides = [1, 1]} : vector<2x128xf32> to vector<2x32xf32>
    %173 = math.tanh %172 : vector<2x32xf32>
    %174 = vector.extract_strided_slice %159 {offsets = [0, 96], sizes = [2, 32], strides = [1, 1]} : vector<2x128xf32> to vector<2x32xf32>
    %175 = arith.negf %174 : vector<2x32xf32>
    %176 = math.exp %175 : vector<2x32xf32>
    %cst_65 = arith.constant 1.000000e+00 : f32
    %177 = vector.broadcast %cst_65 : f32 to vector<2x32xf32>
    %178 = arith.addf %177, %176 : vector<2x32xf32>
    %179 = arith.divf %177, %178 : vector<2x32xf32>
    %180 = arith.mulf %171, %146 : vector<2x32xf32>
    %181 = arith.mulf %165, %173 : vector<2x32xf32>
    %182 = arith.addf %180, %181 : vector<2x32xf32>
    %183 = math.tanh %182 : vector<2x32xf32>
    %184 = arith.mulf %179, %183 : vector<2x32xf32>
    %c0_66 = arith.constant 0 : index
    %185 = arith.index_cast %154 : i32 to index
    %c0_67 = arith.constant 0 : index
    %c0_68 = arith.constant 0 : index
    %186 = vector.load %arg5[%c0_66, %185, %c0_67, %c0_68] : memref<1x8x2x32xf32, #tpu.memory_space<vmem>>, vector<1x1x2x32xf32>
    %187 = vector.shape_cast %186 : vector<1x1x2x32xf32> to vector<2x32xf32>
    %188 = vector.shape_cast %184 : vector<2x32xf32> to vector<1x1x2x32xf32>
    tpu.vector_store %arg5[%c0_66, %185, %c0_67, %c0_68], %188 {strides = array<i32>} : memref<1x8x2x32xf32, #tpu.memory_space<vmem>>, vector<1x1x2x32xf32>,
    %c4_i32 = arith.constant 4 : i32
    %c7_i32_69 = arith.constant 7 : i32
    %189 = arith.subi %c7_i32_69, %c4_i32 : i32
    %190 = arith.select %42, %189, %c4_i32 : i32
    %191 = arith.index_cast %190 : i32 to index
    %c0_70 = arith.constant 0 : index
    %c0_71 = arith.constant 0 : index
    %192 = vector.load %arg7[%191, %c0_70, %c0_71] : memref<8x2x128xf32, #tpu.memory_space<vmem>>, vector<1x2x128xf32>
    %193 = vector.shape_cast %192 : vector<1x2x128xf32> to vector<2x128xf32>
    %cst_72 = arith.constant dense<0.000000e+00> : vector<2x128xf32>
    %194 = tpu.matmul %184, %41, %cst_72 {dimension_numbers = #tpu.dot_dimension_numbers<[1], [0], [0], [1], [0, 0, 1, 1], [], []>} : vector<2x32xf32>, vector<32x128xf32>, vector<2x128xf32> -> vector<2x128xf32>
    %195 = arith.addf %193, %194 : vector<2x128xf32>
    %196 = vector.extract_strided_slice %195 {offsets = [0, 0], sizes = [2, 32], strides = [1, 1]} : vector<2x128xf32> to vector<2x32xf32>
    %197 = arith.negf %196 : vector<2x32xf32>
    %198 = math.exp %197 : vector<2x32xf32>
    %cst_73 = arith.constant 1.000000e+00 : f32
    %199 = vector.broadcast %cst_73 : f32 to vector<2x32xf32>
    %200 = arith.addf %199, %198 : vector<2x32xf32>
    %201 = arith.divf %199, %200 : vector<2x32xf32>
    %202 = vector.extract_strided_slice %195 {offsets = [0, 32], sizes = [2, 32], strides = [1, 1]} : vector<2x128xf32> to vector<2x32xf32>
    %203 = arith.negf %202 : vector<2x32xf32>
    %204 = math.exp %203 : vector<2x32xf32>
    %cst_74 = arith.constant 1.000000e+00 : f32
    %205 = vector.broadcast %cst_74 : f32 to vector<2x32xf32>
    %206 = arith.addf %205, %204 : vector<2x32xf32>
    %207 = arith.divf %205, %206 : vector<2x32xf32>
    %208 = vector.extract_strided_slice %195 {offsets = [0, 64], sizes = [2, 32], strides = [1, 1]} : vector<2x128xf32> to vector<2x32xf32>
    %209 = math.tanh %208 : vector<2x32xf32>
    %210 = vector.extract_strided_slice %195 {offsets = [0, 96], sizes = [2, 32], strides = [1, 1]} : vector<2x128xf32> to vector<2x32xf32>
    %211 = arith.negf %210 : vector<2x32xf32>
    %212 = math.exp %211 : vector<2x32xf32>
    %cst_75 = arith.constant 1.000000e+00 : f32
    %213 = vector.broadcast %cst_75 : f32 to vector<2x32xf32>
    %214 = arith.addf %213, %212 : vector<2x32xf32>
    %215 = arith.divf %213, %214 : vector<2x32xf32>
    %216 = arith.mulf %207, %182 : vector<2x32xf32>
    %217 = arith.mulf %201, %209 : vector<2x32xf32>
    %218 = arith.addf %216, %217 : vector<2x32xf32>
    %219 = math.tanh %218 : vector<2x32xf32>
    %220 = arith.mulf %215, %219 : vector<2x32xf32>
    %c0_76 = arith.constant 0 : index
    %221 = arith.index_cast %190 : i32 to index
    %c0_77 = arith.constant 0 : index
    %c0_78 = arith.constant 0 : index
    %222 = vector.load %arg5[%c0_76, %221, %c0_77, %c0_78] : memref<1x8x2x32xf32, #tpu.memory_space<vmem>>, vector<1x1x2x32xf32>
    %223 = vector.shape_cast %222 : vector<1x1x2x32xf32> to vector<2x32xf32>
    %224 = vector.shape_cast %220 : vector<2x32xf32> to vector<1x1x2x32xf32>
    tpu.vector_store %arg5[%c0_76, %221, %c0_77, %c0_78], %224 {strides = array<i32>} : memref<1x8x2x32xf32, #tpu.memory_space<vmem>>, vector<1x1x2x32xf32>,
    %c5_i32 = arith.constant 5 : i32
    %c7_i32_79 = arith.constant 7 : i32
    %225 = arith.subi %c7_i32_79, %c5_i32 : i32
    %226 = arith.select %42, %225, %c5_i32 : i32
    %227 = arith.index_cast %226 : i32 to index
    %c0_80 = arith.constant 0 : index
    %c0_81 = arith.constant 0 : index
    %228 = vector.load %arg7[%227, %c0_80, %c0_81] : memref<8x2x128xf32, #tpu.memory_space<vmem>>, vector<1x2x128xf32>
    %229 = vector.shape_cast %228 : vector<1x2x128xf32> to vector<2x128xf32>
    %cst_82 = arith.constant dense<0.000000e+00> : vector<2x128xf32>
    %230 = tpu.matmul %220, %41, %cst_82 {dimension_numbers = #tpu.dot_dimension_numbers<[1], [0], [0], [1], [0, 0, 1, 1], [], []>} : vector<2x32xf32>, vector<32x128xf32>, vector<2x128xf32> -> vector<2x128xf32>
    %231 = arith.addf %229, %230 : vector<2x128xf32>
    %232 = vector.extract_strided_slice %231 {offsets = [0, 0], sizes = [2, 32], strides = [1, 1]} : vector<2x128xf32> to vector<2x32xf32>
    %233 = arith.negf %232 : vector<2x32xf32>
    %234 = math.exp %233 : vector<2x32xf32>
    %cst_83 = arith.constant 1.000000e+00 : f32
    %235 = vector.broadcast %cst_83 : f32 to vector<2x32xf32>
    %236 = arith.addf %235, %234 : vector<2x32xf32>
    %237 = arith.divf %235, %236 : vector<2x32xf32>
    %238 = vector.extract_strided_slice %231 {offsets = [0, 32], sizes = [2, 32], strides = [1, 1]} : vector<2x128xf32> to vector<2x32xf32>
    %239 = arith.negf %238 : vector<2x32xf32>
    %240 = math.exp %239 : vector<2x32xf32>
    %cst_84 = arith.constant 1.000000e+00 : f32
    %241 = vector.broadcast %cst_84 : f32 to vector<2x32xf32>
    %242 = arith.addf %241, %240 : vector<2x32xf32>
    %243 = arith.divf %241, %242 : vector<2x32xf32>
    %244 = vector.extract_strided_slice %231 {offsets = [0, 64], sizes = [2, 32], strides = [1, 1]} : vector<2x128xf32> to vector<2x32xf32>
    %245 = math.tanh %244 : vector<2x32xf32>
    %246 = vector.extract_strided_slice %231 {offsets = [0, 96], sizes = [2, 32], strides = [1, 1]} : vector<2x128xf32> to vector<2x32xf32>
    %247 = arith.negf %246 : vector<2x32xf32>
    %248 = math.exp %247 : vector<2x32xf32>
    %cst_85 = arith.constant 1.000000e+00 : f32
    %249 = vector.broadcast %cst_85 : f32 to vector<2x32xf32>
    %250 = arith.addf %249, %248 : vector<2x32xf32>
    %251 = arith.divf %249, %250 : vector<2x32xf32>
    %252 = arith.mulf %243, %218 : vector<2x32xf32>
    %253 = arith.mulf %237, %245 : vector<2x32xf32>
    %254 = arith.addf %252, %253 : vector<2x32xf32>
    %255 = math.tanh %254 : vector<2x32xf32>
    %256 = arith.mulf %251, %255 : vector<2x32xf32>
    %c0_86 = arith.constant 0 : index
    %257 = arith.index_cast %226 : i32 to index
    %c0_87 = arith.constant 0 : index
    %c0_88 = arith.constant 0 : index
    %258 = vector.load %arg5[%c0_86, %257, %c0_87, %c0_88] : memref<1x8x2x32xf32, #tpu.memory_space<vmem>>, vector<1x1x2x32xf32>
    %259 = vector.shape_cast %258 : vector<1x1x2x32xf32> to vector<2x32xf32>
    %260 = vector.shape_cast %256 : vector<2x32xf32> to vector<1x1x2x32xf32>
    tpu.vector_store %arg5[%c0_86, %257, %c0_87, %c0_88], %260 {strides = array<i32>} : memref<1x8x2x32xf32, #tpu.memory_space<vmem>>, vector<1x1x2x32xf32>,
    %c6_i32 = arith.constant 6 : i32
    %c7_i32_89 = arith.constant 7 : i32
    %261 = arith.subi %c7_i32_89, %c6_i32 : i32
    %262 = arith.select %42, %261, %c6_i32 : i32
    %263 = arith.index_cast %262 : i32 to index
    %c0_90 = arith.constant 0 : index
    %c0_91 = arith.constant 0 : index
    %264 = vector.load %arg7[%263, %c0_90, %c0_91] : memref<8x2x128xf32, #tpu.memory_space<vmem>>, vector<1x2x128xf32>
    %265 = vector.shape_cast %264 : vector<1x2x128xf32> to vector<2x128xf32>
    %cst_92 = arith.constant dense<0.000000e+00> : vector<2x128xf32>
    %266 = tpu.matmul %256, %41, %cst_92 {dimension_numbers = #tpu.dot_dimension_numbers<[1], [0], [0], [1], [0, 0, 1, 1], [], []>} : vector<2x32xf32>, vector<32x128xf32>, vector<2x128xf32> -> vector<2x128xf32>
    %267 = arith.addf %265, %266 : vector<2x128xf32>
    %268 = vector.extract_strided_slice %267 {offsets = [0, 0], sizes = [2, 32], strides = [1, 1]} : vector<2x128xf32> to vector<2x32xf32>
    %269 = arith.negf %268 : vector<2x32xf32>
    %270 = math.exp %269 : vector<2x32xf32>
    %cst_93 = arith.constant 1.000000e+00 : f32
    %271 = vector.broadcast %cst_93 : f32 to vector<2x32xf32>
    %272 = arith.addf %271, %270 : vector<2x32xf32>
    %273 = arith.divf %271, %272 : vector<2x32xf32>
    %274 = vector.extract_strided_slice %267 {offsets = [0, 32], sizes = [2, 32], strides = [1, 1]} : vector<2x128xf32> to vector<2x32xf32>
    %275 = arith.negf %274 : vector<2x32xf32>
    %276 = math.exp %275 : vector<2x32xf32>
    %cst_94 = arith.constant 1.000000e+00 : f32
    %277 = vector.broadcast %cst_94 : f32 to vector<2x32xf32>
    %278 = arith.addf %277, %276 : vector<2x32xf32>
    %279 = arith.divf %277, %278 : vector<2x32xf32>
    %280 = vector.extract_strided_slice %267 {offsets = [0, 64], sizes = [2, 32], strides = [1, 1]} : vector<2x128xf32> to vector<2x32xf32>
    %281 = math.tanh %280 : vector<2x32xf32>
    %282 = vector.extract_strided_slice %267 {offsets = [0, 96], sizes = [2, 32], strides = [1, 1]} : vector<2x128xf32> to vector<2x32xf32>
    %283 = arith.negf %282 : vector<2x32xf32>
    %284 = math.exp %283 : vector<2x32xf32>
    %cst_95 = arith.constant 1.000000e+00 : f32
    %285 = vector.broadcast %cst_95 : f32 to vector<2x32xf32>
    %286 = arith.addf %285, %284 : vector<2x32xf32>
    %287 = arith.divf %285, %286 : vector<2x32xf32>
    %288 = arith.mulf %279, %254 : vector<2x32xf32>
    %289 = arith.mulf %273, %281 : vector<2x32xf32>
    %290 = arith.addf %288, %289 : vector<2x32xf32>
    %291 = math.tanh %290 : vector<2x32xf32>
    %292 = arith.mulf %287, %291 : vector<2x32xf32>
    %c0_96 = arith.constant 0 : index
    %293 = arith.index_cast %262 : i32 to index
    %c0_97 = arith.constant 0 : index
    %c0_98 = arith.constant 0 : index
    %294 = vector.load %arg5[%c0_96, %293, %c0_97, %c0_98] : memref<1x8x2x32xf32, #tpu.memory_space<vmem>>, vector<1x1x2x32xf32>
    %295 = vector.shape_cast %294 : vector<1x1x2x32xf32> to vector<2x32xf32>
    %296 = vector.shape_cast %292 : vector<2x32xf32> to vector<1x1x2x32xf32>
    tpu.vector_store %arg5[%c0_96, %293, %c0_97, %c0_98], %296 {strides = array<i32>} : memref<1x8x2x32xf32, #tpu.memory_space<vmem>>, vector<1x1x2x32xf32>,
    %c7_i32_99 = arith.constant 7 : i32
    %c7_i32_100 = arith.constant 7 : i32
    %297 = arith.subi %c7_i32_100, %c7_i32_99 : i32
    %298 = arith.select %42, %297, %c7_i32_99 : i32
    %299 = arith.index_cast %298 : i32 to index
    %c0_101 = arith.constant 0 : index
    %c0_102 = arith.constant 0 : index
    %300 = vector.load %arg7[%299, %c0_101, %c0_102] : memref<8x2x128xf32, #tpu.memory_space<vmem>>, vector<1x2x128xf32>
    %301 = vector.shape_cast %300 : vector<1x2x128xf32> to vector<2x128xf32>
    %cst_103 = arith.constant dense<0.000000e+00> : vector<2x128xf32>
    %302 = tpu.matmul %292, %41, %cst_103 {dimension_numbers = #tpu.dot_dimension_numbers<[1], [0], [0], [1], [0, 0, 1, 1], [], []>} : vector<2x32xf32>, vector<32x128xf32>, vector<2x128xf32> -> vector<2x128xf32>
    %303 = arith.addf %301, %302 : vector<2x128xf32>
    %304 = vector.extract_strided_slice %303 {offsets = [0, 0], sizes = [2, 32], strides = [1, 1]} : vector<2x128xf32> to vector<2x32xf32>
    %305 = arith.negf %304 : vector<2x32xf32>
    %306 = math.exp %305 : vector<2x32xf32>
    %cst_104 = arith.constant 1.000000e+00 : f32
    %307 = vector.broadcast %cst_104 : f32 to vector<2x32xf32>
    %308 = arith.addf %307, %306 : vector<2x32xf32>
    %309 = arith.divf %307, %308 : vector<2x32xf32>
    %310 = vector.extract_strided_slice %303 {offsets = [0, 32], sizes = [2, 32], strides = [1, 1]} : vector<2x128xf32> to vector<2x32xf32>
    %311 = arith.negf %310 : vector<2x32xf32>
    %312 = math.exp %311 : vector<2x32xf32>
    %cst_105 = arith.constant 1.000000e+00 : f32
    %313 = vector.broadcast %cst_105 : f32 to vector<2x32xf32>
    %314 = arith.addf %313, %312 : vector<2x32xf32>
    %315 = arith.divf %313, %314 : vector<2x32xf32>
    %316 = vector.extract_strided_slice %303 {offsets = [0, 64], sizes = [2, 32], strides = [1, 1]} : vector<2x128xf32> to vector<2x32xf32>
    %317 = math.tanh %316 : vector<2x32xf32>
    %318 = vector.extract_strided_slice %303 {offsets = [0, 96], sizes = [2, 32], strides = [1, 1]} : vector<2x128xf32> to vector<2x32xf32>
    %319 = arith.negf %318 : vector<2x32xf32>
    %320 = math.exp %319 : vector<2x32xf32>
    %cst_106 = arith.constant 1.000000e+00 : f32
    %321 = vector.broadcast %cst_106 : f32 to vector<2x32xf32>
    %322 = arith.addf %321, %320 : vector<2x32xf32>
    %323 = arith.divf %321, %322 : vector<2x32xf32>
    %324 = arith.mulf %315, %290 : vector<2x32xf32>
    %325 = arith.mulf %309, %317 : vector<2x32xf32>
    %326 = arith.addf %324, %325 : vector<2x32xf32>
    %327 = math.tanh %326 : vector<2x32xf32>
    %328 = arith.mulf %323, %327 : vector<2x32xf32>
    %c0_107 = arith.constant 0 : index
    %329 = arith.index_cast %298 : i32 to index
    %c0_108 = arith.constant 0 : index
    %c0_109 = arith.constant 0 : index
    %330 = vector.load %arg5[%c0_107, %329, %c0_108, %c0_109] : memref<1x8x2x32xf32, #tpu.memory_space<vmem>>, vector<1x1x2x32xf32>
    %331 = vector.shape_cast %330 : vector<1x1x2x32xf32> to vector<2x32xf32>
    %332 = vector.shape_cast %328 : vector<2x32xf32> to vector<1x1x2x32xf32>
    tpu.vector_store %arg5[%c0_107, %329, %c0_108, %c0_109], %332 {strides = array<i32>} : memref<1x8x2x32xf32, #tpu.memory_space<vmem>>, vector<1x1x2x32xf32>,
    %c8_i32 = arith.constant 8 : i32
    %c0_110 = arith.constant 0 : index
    %c0_111 = arith.constant 0 : index
    %c0_112 = arith.constant 0 : index
    %333 = vector.load %arg6[%c0_110, %c0_111, %c0_112] : memref<1x2x32xf32, #tpu.memory_space<vmem>>, vector<1x2x32xf32>
    %334 = vector.shape_cast %333 : vector<1x2x32xf32> to vector<2x32xf32>
    %335 = vector.shape_cast %328 : vector<2x32xf32> to vector<1x2x32xf32>
    tpu.vector_store %arg6[%c0_110, %c0_111, %c0_112], %335 {strides = array<i32>} : memref<1x2x32xf32, #tpu.memory_space<vmem>>, vector<1x2x32xf32>,
    return
  }
  func.func @transform_0(%arg0: i32) -> (i32, i32) {
    %c0_i32 = arith.constant 0 : i32
    %c0_i32_0 = arith.constant 0 : i32
    %c0_i32_1 = arith.constant 0 : i32
    return %c0_i32, %c0_i32_0 : i32, i32
  }
  func.func @transform_1(%arg0: i32) -> (i32, i32, i32) {
    %c0_i32 = arith.constant 0 : i32
    %c0_i32_0 = arith.constant 0 : i32
    %c0_i32_1 = arith.constant 0 : i32
    return %arg0, %c0_i32, %c0_i32_0 : i32, i32, i32
  }
  func.func @transform_2(%arg0: i32) -> (i32, i32, i32) {
    %c0_i32 = arith.constant 0 : i32
    %c0_i32_0 = arith.constant 0 : i32
    %c0_i32_1 = arith.constant 0 : i32
    return %arg0, %c0_i32, %c0_i32_0 : i32, i32, i32
  }
  func.func @transform_3(%arg0: i32) -> (i32, i32, i32) {
    %c0_i32 = arith.constant 0 : i32
    %c0_i32_0 = arith.constant 0 : i32
    %c0_i32_1 = arith.constant 0 : i32
    return %arg0, %c0_i32, %c0_i32_0 : i32, i32, i32
  }
  func.func @transform_4(%arg0: i32) -> (i32, i32, i32, i32) {
    %c0_i32 = arith.constant 0 : i32
    %c0_i32_0 = arith.constant 0 : i32
    %c0_i32_1 = arith.constant 0 : i32
    %c0_i32_2 = arith.constant 0 : i32
    return %arg0, %c0_i32, %c0_i32_0, %c0_i32_1 : i32, i32, i32, i32
  }
  func.func @transform_5(%arg0: i32) -> (i32, i32, i32) {
    %c0_i32 = arith.constant 0 : i32
    %c0_i32_0 = arith.constant 0 : i32
    %c0_i32_1 = arith.constant 0 : i32
    return %arg0, %c0_i32, %c0_i32_0 : i32, i32, i32
  }
}

</mosaic_0001>

<bundles_post_ra>
// kernel: text_rnn_forward.5
= control target key start
LH: loop header
LB: loop body
LE: loop exit
PB: predicated region body
PF: predicated region fallthrough
CT: control target
= control target key end

     0   :  { %s180_s0 = inlined_call_operand.vmem [shape: f32[2,128], index: 0, kind: input, shape index: {}]   ;;  %s181_s1 = inlined_call_operand.vmem [shape: f32[128,4], index: 1, kind: input, shape index: {}]   ;;  %s182_s2 = inlined_call_operand.vmem [shape: f32[1,4], index: 2, kind: input, shape index: {}]   ;;  %s183_s3 = inlined_call_operand.hbm [shape: f32[2,4], index: 3, kind: output, shape index: {}]  }
   0x1   :  { %v31_v0 = vld [vmem:[%s181_s1 + $0x78] sm:$0xff]  ;;  %v30_v1 = vld [vmem:[%s181_s1 + $0x70] sm:$0xff]  ;;  %v29_v2 = vld [vmem:[%s181_s1 + $0x68] sm:$0xff] }
   0x2   :  { %36 = vmatpush.msra.mxu0 %v31_v0  ;;  %v28_v3 = vld [vmem:[%s181_s1 + $0x60] sm:$0xff]  ;;  %v27_v4 = vld [vmem:[%s181_s1 + $0x58] sm:$0xff] }
   0x4   :  { %37 = vmatpush.msra.mxu0 %v30_v1 }
   0x6   :  { %38 = vmatpush.msra.mxu0 %v29_v2 }
   0x7   :  { %8 = vsyncpa [#allocation3], 0  ;;  %v26_v5 = vld [vmem:[%s181_s1 + $0x50] sm:$0xff]  ;;  %v25_v6 = vld [vmem:[%s181_s1 + $0x48] sm:$0xff]  ;;  %s102_s21 = smov [#allocation2]   ;;  %s65_s25 = sshll.u32 %s183_s3, 4  ;;  %s66_s25 = int_to_ptr.hbm [resolvable:$true] %s65_s25 }
   0x8   :  { %39 = vmatpush.msra.mxu0 %v28_v3  ;;  %v24_v7 = vld [vmem:[%s181_s1 + $0x40] sm:$0xff]  ;;  %v23_v8 = vld [vmem:[%s181_s1 + $0x38] sm:$0xff]  ;;  %v22_v9 = vld [vmem:[%s181_s1 + $0x30] sm:$0xff]  ;;  %s63_s22 = sshll.u32 %s102_s21, 4  ;;  %vm56_vm0 = vcmask 25600   ;;  %s64_s22 = int_to_ptr.vmem [resolvable:$true] %s63_s22 }
   0x9   :  { %v21_v10 = vld [vmem:[%s181_s1 + $0x28] sm:$0xff]  ;;  %v20_v11 = vld [vmem:[%s181_s1 + $0x20] sm:$0xff]  ;;  %v19_v12 = vld [vmem:[%s181_s1 + $0x18] sm:$0xff] }
   0xa   :  { %40 = vmatpush.msra.mxu0 %v27_v4  ;;  %v18_v13 = vld [vmem:[%s181_s1 + $0x10] sm:$0xff]  ;;  %v17_v14 = vld [vmem:[%s181_s1 + $0x8] sm:$0xff]  ;;  %v16_v15 = vld [vmem:[%s181_s1] sm:$0xff] }
   0xb   :  { %v15_v16 = vld [vmem:[%s180_s0] sm:$0x3] }
   0xc   :  { %41 = vmatpush.msra.mxu0 %v26_v5  ;;  %v75_v17 = vld [vmem:[%s182_s2] ss:$0 sm:$0xff] }
   0xe   :  { %42 = vmatpush.msra.mxu0 %v25_v6 }
  0x10   :  { %43 = vmatpush.msra.mxu0 %v24_v7 }
  0x12   :  { %44 = vmatpush.msra.mxu0 %v23_v8 }
  0x14   :  { %45 = vmatpush.msra.mxu0 %v22_v9 }
  0x16   :  { %46 = vmatpush.msra.mxu0 %v21_v10 }
  0x18   :  { %47 = vmatpush.msra.mxu0 %v20_v11 }
  0x1a   :  { %48 = vmatpush.msra.mxu0 %v19_v12 }
  0x1c   :  { %49 = vmatpush.msra.mxu0 %v18_v13 }
  0x1e   :  { %50 = vmatpush.msra.mxu0 %v17_v14 }
  0x20   :  { %51 = vmatpush.msra.mxu0 %v16_v15 }
  0x21   :  { %52 = vmatmul.f32.vlgmr.msra.gmra.mxu0 %v15_v16 }
  0x9e   :  { %v53_v18 = vpop.f32.mrf.mxu0 }
  0x9f   :  { %v54_v19 = vadd.f32 %v75_v17, %v53_v18 }
  0xa1   :  { %57 = vst.msk [vmem:[#allocation2] sm:$0x3] %vm56_vm0, %v54_v19 }
  0xa2   :  { %68 = dma.vmem_to_hbm [thread:$0]  %s64_s22, 32, %s66_s25, [#allocation3]  }
  0xa3   :  { %100 = dma.done.wait [#allocation3], 32  }
  0xa4   :  { %101 = vsyncadd [#allocation3], 4294967264 }
  0xa5   :  { %73 = vsyncpa [#allocation3], 1 }

// kernel: text_rnn_forward.3
= control target key start
LH: loop header
LB: loop body
LE: loop exit
PB: predicated region body
PF: predicated region fallthrough
CT: control target
= control target key end

     0   :  { %s1191_s18 = smov 0   ;;  %s1371_s0 = inlined_call_operand.vmem [shape: f32[16,32], index: 0, kind: input, shape index: {}]   ;;  %s1372_s1 = inlined_call_operand.vmem [shape: f32[2,32,128], index: 1, kind: input, shape index: {}]   ;;  %s1373_s2 = inlined_call_operand.vmem [shape: f32[2,32,128], index: 2, kind: input, shape index: {}]   ;;  %s1374_s3 = inlined_call_operand.vmem [shape: f32[2,1,128], index: 3, kind: input, shape index: {}]   ;;  %s1375_s4 = inlined_call_operand.vmem [shape: f32[2,8,2,32], index: 4, kind: output, shape index: {0}]   ;;  %s1376_s5 = inlined_call_operand.vmem [shape: f32[2,2,32], index: 5, kind: output, shape index: {1}]  }
   0x1 LB: > { %s1197_s19 = sadd.s32 4294967295, %s1156_s18   ;;  %p1036_p0 = scmp.ge.s32.totalorder %s1156_s18, 1  ;;  %s1156_s18 = sphi %s1191_s18, %s16_s18  }
   0x2   : > { %p208_p1 = scmp.lt.s32.totalorder %s1156_s18, 3 }
   0x4   : > { %p209_p2 = pnand %p1036_p0, %p208_p1 }
   0x5   : > { %p248_p3 = scmp.lt.s32.totalorder (!%p209_p2), %s1197_s19, 1  ;;  %p329_p4 = scmp.eq.s32.totalorder (!%p209_p2), %s1197_s19, 1 }
   0x6   : > { %212 = sbr.rel (%p209_p2) target bundleno = 4692 (0x1254), region = 36  ;;  %s1159_s15 = smov (!%p209_p2), 64  }
   0x7   : > { %s1160_s16 = smov (!%p209_p2), 32  }
   0xb   : > { %s1203_s20 = scalar_select %p248_p3, %s1197_s19, 1  ;;  %v270_v8 = vld [vmem:[%s1371_s0] sm:$0xff]  ;;  %vm280_vm0 = vcmask 261120   ;;  %v1158_v9 = vmov 0.0   ;;  %v271_v10 = vld [vmem:[%s1371_s0 + $0x8] sm:$0xff]  ;;  %vm400_vm5 = vcmask 254976  }
   0xc   : > { %s1232_s12 = scalar_select %p329_p4, 7, 0 }
   0xd   : > { %s1071_s21 = sshll.u32 %s1203_s20, 5  ;;  %s260_s24 = scalar_lea.vmem %s1374_s3, %s1203_s20 }
   0xe   : > { %s252_s27 = scalar_lea.vmem %s1372_s1, %s1071_s21  ;;  %s257_s30 = scalar_lea.vmem %s1373_s2, %s1071_s21  ;;  %v1085_v11 = vld [vmem:[%s260_s24] ss:$0 sm:$0xff] }
   0xf   : > { %v275_v0 = vld [vmem:[%s252_s27 + $0x18] sm:$0xff]  ;;  %v327_v1 = vld [vmem:[%s257_s30 + $0x10] sm:$0xff]  ;;  %v273_v4 = vld [vmem:[%s252_s27 + $0x8] sm:$0xff]  ;;  %s1046_s13 = sshll.u32 %s1232_s12, 1  ;;  %s1073_s17 = sshll.u32 %s1203_s20, 4 }
  0x10   : > { %299 = vmatpush.msra.mxu0 %v275_v0  ;;  %v328_v2 = vld [vmem:[%s257_s30 + $0x18] sm:$0xff]  ;;  %v274_v3 = vld [vmem:[%s252_s27 + $0x10] sm:$0xff]  ;;  %v326_v5 = vld [vmem:[%s257_s30 + $0x8] sm:$0xff]  ;;  %s332_s14 = scalar_lea.vmem [#allocation2], %s1046_s13  ;;  %s1245_s23 = scalar_lea.vmem %s1375_s4, %s1073_s17 }
  0x11   : > { %349 = vmatpush.msra.mxu1 %v328_v2  ;;  %420 = vmatpush.msra.mxu2 %v328_v2  ;;  %v272_v6 = vld [vmem:[%s252_s27] sm:$0xff]  ;;  %s399_s24 = scalar_lea.vmem %s1245_s23, %s1046_s13  ;;  %s1043_s19 = sshll.u32 %s1203_s20, 1 }
  0x12   : > { %300 = vmatpush.msra.mxu0 %v274_v3  ;;  %490 = vmatpush.msra.mxu3 %v328_v2  ;;  %v325_v7 = vld [vmem:[%s257_s30] sm:$0xff]  ;;  %s1254_s25 = scalar_select %p329_p4, 6, 1 }
  0x13   : > { %350 = vmatpush.msra.mxu1 %v327_v1  ;;  %421 = vmatpush.msra.mxu2 %v327_v1  ;;  %s1270_s29 = scalar_select %p329_p4, 5, 2 }
  0x14   : > { %301 = vmatpush.msra.mxu0 %v273_v4  ;;  %491 = vmatpush.msra.mxu3 %v327_v1  ;;  %s1048_s26 = sshll.u32 %s1254_s25, 1 }
  0x15   : > { %351 = vmatpush.msra.mxu1 %v326_v5  ;;  %422 = vmatpush.msra.mxu2 %v326_v5  ;;  %s404_s27 = scalar_lea.vmem [#allocation2], %s1048_s26  ;;  %s470_s28 = scalar_lea.vmem %s1245_s23, %s1048_s26 }
  0x16   : > { %302 = vmatpush.msra.mxu0 %v272_v6  ;;  %492 = vmatpush.msra.mxu3 %v326_v5  ;;  %s1051_s30 = sshll.u32 %s1270_s29, 1 }
  0x17   : > { %1044 = vmatmul.msk.f32.vlgmr.msra.gmra.mxu0 %vm280_vm0, %v270_v8  ;;  %352 = vmatpush.msra.mxu1 %v325_v7  ;;  %s474_s6 = scalar_lea.vmem [#allocation2], %s1051_s30  ;;  %s540_s7 = scalar_lea.vmem %s1245_s23, %s1051_s30 }
  0x18   : > { %353 = vmatmul.f32.vlgmr.msra.gmra.mxu1 %v1158_v9  ;;  %423 = vmatpush.msra.mxu2 %v325_v7  ;;  %s1286_s8 = scalar_select %p329_p4, 4, 3 }
  0x19   : > { %493 = vmatpush.msra.mxu3 %v325_v7  ;;  %560 = vmatpush.msrb.mxu1 %v328_v2  ;;  %s1302_s12 = scalar_select %p329_p4, 3, 4 }
  0x1a   : > { %630 = vmatpush.msrb.mxu2 %v328_v2  ;;  %770 = vmatpush.msrb.mxu0 %v328_v2  ;;  %s1054_s9 = sshll.u32 %s1286_s8, 1 }
  0x1b   : > { %700 = vmatpush.msrb.mxu3 %v328_v2  ;;  %561 = vmatpush.msrb.mxu1 %v327_v1  ;;  %s544_s10 = scalar_lea.vmem [#allocation2], %s1054_s9  ;;  %s610_s11 = scalar_lea.vmem %s1245_s23, %s1054_s9 }
  0x1c   : > { %631 = vmatpush.msrb.mxu2 %v327_v1  ;;  %771 = vmatpush.msrb.mxu0 %v327_v1  ;;  %s1057_s13 = sshll.u32 %s1302_s12, 1 }
  0x1d   : > { %701 = vmatpush.msrb.mxu3 %v327_v1  ;;  %562 = vmatpush.msrb.mxu1 %v326_v5  ;;  %s680_s17 = scalar_lea.vmem %s1245_s23, %s1057_s13 }
  0x1e   : > { %632 = vmatpush.msrb.mxu2 %v326_v5  ;;  %772 = vmatpush.msrb.mxu0 %v326_v5  ;;  %s1318_s21 = scalar_select %p329_p4, 2, 5 }
  0x1f   : > { %702 = vmatpush.msrb.mxu3 %v326_v5  ;;  %1045 = vmatmul.msk.f32.gmra.mxu0 %vm280_vm0, %v271_v10  ;;  %s1334_s26 = scalar_select %p329_p4, 1, 6 }
  0x20   : > { %563 = vmatpush.msrb.mxu1 %v325_v7  ;;  %633 = vmatpush.msrb.mxu2 %v325_v7  ;;  %s1060_s22 = sshll.u32 %s1318_s21, 1 }
  0x21   : > { %703 = vmatpush.msrb.mxu3 %v325_v7  ;;  %773 = vmatpush.msrb.mxu0 %v325_v7  ;;  %s750_s25 = scalar_lea.vmem %s1245_s23, %s1060_s22 }
  0x22   : > { %840 = vmatpush.msra.mxu1 %v328_v2  ;;  %s1350_s30 = scalar_select %p329_p4, 0, 7 }
  0x24   : > { %841 = vmatpush.msra.mxu1 %v327_v1 }
  0x26   : > { %842 = vmatpush.msra.mxu1 %v326_v5 }
  0x28   : > { %843 = vmatpush.msra.mxu1 %v325_v7 }
  0x94   : > { %v304_v12 = vpop.f32.mrf.mxu0 }
  0x95   : > { %v305_v13 = vadd.f32 %v1085_v11, %v304_v12  ;;  %v354_v16 = vpop.f32.mrf.mxu1 }
  0x97   : > { %310 = vst [vmem:[#allocation2] sm:$0xf] %v305_v13  }
  0x98   : > { %314 = vst [vmem:[#allocation2] sm:$0xf0] %v305_v13  }
  0x9c   : > { %v307_v14 = vpop.f32.mrf.mxu0 }
  0x9d   : > { %v308_v15 = vadd.f32 %v1085_v11, %v307_v14 }
  0x9f   : > { %318 = vst [vmem:[#allocation2 + $0x8] sm:$0xf] %v308_v15  }
  0xa0   : > { %322 = vst [vmem:[#allocation2 + $0x8] sm:$0xf0] %v308_v15  }
  0xa7   : > { %v333_v17 = vld [vmem:[%s332_s14] sm:$0x3]  ;;  %s614_s14 = scalar_lea.vmem [#allocation2], %s1057_s13 }
  0xa8   : > { %v357_v18 = vadd.f32 %v354_v16, %v333_v17  ;;  %v405_v42 = vld [vmem:[%s404_s27] sm:$0x3]  ;;  %s1063_s27 = sshll.u32 %s1334_s26, 1 }
  0xa9   : > { %v475_v4 = vld [vmem:[%s474_s6] sm:$0x3]  ;;  %s820_s29 = scalar_lea.vmem %s1245_s23, %s1063_s27  ;;  %s1066_s6 = sshll.u32 %s1350_s30, 1 }
  0xaa   : > { %1086 = vtanh.f32 %v357_v18  ;;  %v1047_v20 = vmul.f32 -1.442695, %v357_v18  ;;  %s890_s8 = scalar_lea.vmem %s1245_s23, %s1066_s6 }
  0xac   : > { %1088 = vpow2.f32 %v1047_v20 }
  0xb0   : > { %v1087_v19 = vpop.eup %1086 }
  0xb1   : > { %380 = vrot.lane.b32.xlu0 %v1087_v19, %s1159_s15 }
  0xb2   : > { %v1089_v21 = vpop.eup %1088 }
  0xb3   : > { %v361_v22 = vadd.f32 1.0, %v1089_v21 }
  0xb5   : > { %1090 = vrcp.f32 %v361_v22  ;;  %v373_v28 = vand.u32 2147483648, %v361_v22  ;;  %vm367_vm2 = vweird.f32 %v361_v22  ;;  %v371_v29 = vand.u32 2147483647, %v361_v22 }
  0xb7   : > { %v374_v31 = vor.u32 1.1754944e-38, %v373_v28  ;;  %vm372_vm4 = vcmp.eq.f32.partialorder %v371_v29, 8.507059e+37 }
  0xbb   : > { %v1091_v23 = vpop.eup %1090 }
  0xbc   : > { %v363_v24 = vmul.f32 %v1091_v23, %v361_v22  ;;  %vm368_vm1 = vweird.f32 %v1091_v23 }
  0xbd   : > { %vm369_vm3 = vmor %vm367_vm2, %vm368_vm1 }
  0xbe   : > { %v364_v25 = vsub.f32 1.0, %v363_v24 }
  0xc0   : > { %v365_v26 = vmul.f32 %v1091_v23, %v364_v25 }
  0xc2   : > { %v366_v27 = vadd.f32 %v1091_v23, %v365_v26 }
  0xc4   : > { %v370_v30 = vsel %vm369_vm3, %v1091_v23, %v366_v27 }
  0xc5   : > { %v375_v33 = vsel %vm372_vm4, %v374_v31, %v370_v30  ;;  %v545_v30 = vld [vmem:[%s544_s10] sm:$0x3] }
  0xc6   : > { %v378_v35 = vmul.f32 0.0, %v375_v33 }
 0x123   : > { %v381_v32 = vpop.permute.xlu0 %380 }
 0x124   : > { %v383_v34 = vmul.f32 %v381_v32, %v375_v33 }
 0x126   : > { %385 = vrot.lane.b32.xlu0 %v383_v34, %s1160_s16 }
 0x198   : > { %v386_v36 = vpop.permute.xlu0 %385 }
 0x199   : > { %v388_v37 = vadd.f32 %v386_v36, %v378_v35 }
 0x19b   : > { %1092 = vtanh.f32 %v388_v37 }
 0x1a1   : > { %v1093_v38 = vpop.eup %1092 }
 0x1a2   : > { %391 = vrot.lane.b32.xlu1 %v1093_v38, %s1159_s15 }
 0x214   : > { %v392_v39 = vpop.permute.xlu1 %391 }
 0x215   : > { %v394_v40 = vmul.f32 %v392_v39, %v375_v33 }
 0x217   : > { %396 = vrot.lane.b32.xlu1 %v394_v40, %s1160_s16 }
 0x289   : > { %v397_v41 = vpop.permute.xlu1 %396 }
 0x28a   : > { %401 = vst.msk [vmem:[%s399_s24] sm:$0x3] %vm400_vm5, %v397_v41  ;;  %1049 = vmatmul.msk.f32.vlgmr.msra.gmra.mxu2 %vm280_vm0, %v397_v41  ;;  %s684_s24 = scalar_lea.vmem [#allocation2], %s1060_s22 }
 0x30d   : > { %v425_v43 = vpop.f32.mrf.mxu2 }
 0x30e   : > { %v428_v44 = vadd.f32 %v425_v43, %v405_v42 }
 0x310   : > { %1094 = vtanh.f32 %v428_v44  ;;  %v1050_v46 = vmul.f32 -1.442695, %v428_v44 }
 0x312   : > { %1096 = vpow2.f32 %v1050_v46 }
 0x316   : > { %v1095_v45 = vpop.eup %1094 }
 0x317   : > { %451 = vrot.lane.b32.xlu2 %v1095_v45, %s1159_s15 }
 0x318   : > { %v1097_v47 = vpop.eup %1096 }
 0x319   : > { %v432_v48 = vadd.f32 1.0, %v1097_v47 }
 0x31b   : > { %1098 = vrcp.f32 %v432_v48  ;;  %v444_v54 = vand.u32 2147483648, %v432_v48  ;;  %vm438_vm7 = vweird.f32 %v432_v48  ;;  %v442_v55 = vand.u32 2147483647, %v432_v48 }
 0x31d   : > { %v445_v57 = vor.u32 1.1754944e-38, %v444_v54  ;;  %vm443_vm9 = vcmp.eq.f32.partialorder %v442_v55, 8.507059e+37 }
 0x321   : > { %v1099_v49 = vpop.eup %1098 }
 0x322   : > { %v434_v50 = vmul.f32 %v1099_v49, %v432_v48  ;;  %vm439_vm6 = vweird.f32 %v1099_v49 }
 0x323   : > { %vm440_vm8 = vmor %vm438_vm7, %vm439_vm6 }
 0x324   : > { %v435_v51 = vsub.f32 1.0, %v434_v50 }
 0x326   : > { %v436_v52 = vmul.f32 %v1099_v49, %v435_v51 }
 0x328   : > { %v437_v53 = vadd.f32 %v1099_v49, %v436_v52 }
 0x32a   : > { %v441_v56 = vsel %vm440_vm8, %v1099_v49, %v437_v53 }
 0x32b   : > { %v446_v59 = vsel %vm443_vm9, %v445_v57, %v441_v56  ;;  %v615_v56 = vld [vmem:[%s614_s14] sm:$0x3] }
 0x32c   : > { %v449_v61 = vmul.f32 %v446_v59, %v388_v37 }
 0x371   : > { %v452_v58 = vpop.permute.xlu2 %451 }
 0x372   : > { %v454_v60 = vmul.f32 %v452_v58, %v446_v59 }
 0x374   : > { %456 = vrot.lane.b32.xlu2 %v454_v60, %s1160_s16 }
 0x3ce   : > { %v457_v62 = vpop.permute.xlu2 %456 }
 0x3cf   : > { %v459_v63 = vadd.f32 %v457_v62, %v449_v61 }
 0x3d1   : > { %1100 = vtanh.f32 %v459_v63 }
 0x3d7   : > { %v1101_v0 = vpop.eup %1100 }
 0x3d8   : > { %462 = vrot.lane.b32.xlu0 %v1101_v0, %s1159_s15 }
 0x44a   : > { %v463_v1 = vpop.permute.xlu0 %462 }
 0x44b   : > { %v465_v2 = vmul.f32 %v463_v1, %v446_v59 }
 0x44d   : > { %467 = vrot.lane.b32.xlu1 %v465_v2, %s1160_s16 }
 0x4bf   : > { %v468_v3 = vpop.permute.xlu1 %467 }
 0x4c0   : > { %471 = vst.msk [vmem:[%s470_s28] sm:$0x3] %vm400_vm5, %v468_v3  ;;  %1052 = vmatmul.msk.f32.vlgmr.msra.gmra.mxu3 %vm280_vm0, %v468_v3  ;;  %s754_s28 = scalar_lea.vmem [#allocation2], %s1063_s27 }
 0x543   : > { %v495_v5 = vpop.f32.mrf.mxu3 }
 0x544   : > { %v498_v6 = vadd.f32 %v495_v5, %v475_v4 }
 0x546   : > { %1102 = vtanh.f32 %v498_v6  ;;  %v1053_v8 = vmul.f32 -1.442695, %v498_v6 }
 0x548   : > { %1104 = vpow2.f32 %v1053_v8 }
 0x54c   : > { %v1103_v7 = vpop.eup %1102 }
 0x54d   : > { %521 = vrot.lane.b32.xlu2 %v1103_v7, %s1159_s15 }
 0x54e   : > { %v1105_v9 = vpop.eup %1104 }
 0x54f   : > { %v502_v10 = vadd.f32 1.0, %v1105_v9 }
 0x551   : > { %1106 = vrcp.f32 %v502_v10  ;;  %v514_v16 = vand.u32 2147483648, %v502_v10  ;;  %vm508_vm11 = vweird.f32 %v502_v10  ;;  %v512_v17 = vand.u32 2147483647, %v502_v10 }
 0x553   : > { %v515_v19 = vor.u32 1.1754944e-38, %v514_v16  ;;  %vm513_vm13 = vcmp.eq.f32.partialorder %v512_v17, 8.507059e+37 }
 0x557   : > { %v1107_v11 = vpop.eup %1106 }
 0x558   : > { %v504_v12 = vmul.f32 %v1107_v11, %v502_v10  ;;  %vm509_vm10 = vweird.f32 %v1107_v11 }
 0x559   : > { %vm510_vm12 = vmor %vm508_vm11, %vm509_vm10 }
 0x55a   : > { %v505_v13 = vsub.f32 1.0, %v504_v12 }
 0x55c   : > { %v506_v14 = vmul.f32 %v1107_v11, %v505_v13 }
 0x55e   : > { %v507_v15 = vadd.f32 %v1107_v11, %v506_v14 }
 0x560   : > { %v511_v18 = vsel %vm510_vm12, %v1107_v11, %v507_v15 }
 0x561   : > { %v516_v21 = vsel %vm513_vm13, %v515_v19, %v511_v18  ;;  %v685_v18 = vld [vmem:[%s684_s24] sm:$0x3] }
 0x562   : > { %v519_v23 = vmul.f32 %v516_v21, %v459_v63 }
 0x5a7   : > { %v522_v20 = vpop.permute.xlu2 %521 }
 0x5a8   : > { %v524_v22 = vmul.f32 %v522_v20, %v516_v21 }
 0x5aa   : > { %526 = vrot.lane.b32.xlu0 %v524_v22, %s1160_s16 }
 0x61c   : > { %v527_v24 = vpop.permute.xlu0 %526 }
 0x61d   : > { %v529_v25 = vadd.f32 %v527_v24, %v519_v23 }
 0x61f   : > { %1108 = vtanh.f32 %v529_v25 }
 0x625   : > { %v1109_v26 = vpop.eup %1108 }
 0x626   : > { %532 = vrot.lane.b32.xlu1 %v1109_v26, %s1159_s15 }
 0x698   : > { %v533_v27 = vpop.permute.xlu1 %532 }
 0x699   : > { %v535_v28 = vmul.f32 %v533_v27, %v516_v21 }
 0x69b   : > { %537 = vrot.lane.b32.xlu2 %v535_v28, %s1160_s16 }
 0x6f5   : > { %v538_v29 = vpop.permute.xlu2 %537 }
 0x6f6   : > { %541 = vst.msk [vmem:[%s540_s7] sm:$0x3] %vm400_vm5, %v538_v29  ;;  %1055 = vmatmul.msk.f32.vlgmr.msrb.gmra.mxu1 %vm280_vm0, %v538_v29  ;;  %s824_s7 = scalar_lea.vmem [#allocation2], %s1066_s6 }
 0x773   : > { %v565_v31 = vpop.f32.mrf.mxu1 }
 0x774   : > { %v568_v32 = vadd.f32 %v565_v31, %v545_v30 }
 0x776   : > { %1110 = vtanh.f32 %v568_v32  ;;  %v1056_v34 = vmul.f32 -1.442695, %v568_v32 }
 0x778   : > { %1112 = vpow2.f32 %v1056_v34 }
 0x77c   : > { %v1111_v33 = vpop.eup %1110 }
 0x77d   : > { %591 = vrot.lane.b32.xlu0 %v1111_v33, %s1159_s15 }
 0x77e   : > { %v1113_v35 = vpop.eup %1112 }
 0x77f   : > { %v572_v36 = vadd.f32 1.0, %v1113_v35 }
 0x781   : > { %1114 = vrcp.f32 %v572_v36  ;;  %v584_v42 = vand.u32 2147483648, %v572_v36  ;;  %vm578_vm15 = vweird.f32 %v572_v36  ;;  %v582_v43 = vand.u32 2147483647, %v572_v36 }
 0x783   : > { %v585_v45 = vor.u32 1.1754944e-38, %v584_v42  ;;  %vm583_vm2 = vcmp.eq.f32.partialorder %v582_v43, 8.507059e+37 }
 0x787   : > { %v1115_v37 = vpop.eup %1114 }
 0x788   : > { %v574_v38 = vmul.f32 %v1115_v37, %v572_v36  ;;  %vm579_vm14 = vweird.f32 %v1115_v37 }
 0x789   : > { %vm580_vm1 = vmor %vm578_vm15, %vm579_vm14 }
 0x78a   : > { %v575_v39 = vsub.f32 1.0, %v574_v38 }
 0x78c   : > { %v576_v40 = vmul.f32 %v1115_v37, %v575_v39 }
 0x78e   : > { %v577_v41 = vadd.f32 %v1115_v37, %v576_v40 }
 0x790   : > { %v581_v44 = vsel %vm580_vm1, %v1115_v37, %v577_v41 }
 0x791   : > { %v586_v47 = vsel %vm583_vm2, %v585_v45, %v581_v44  ;;  %v755_v44 = vld [vmem:[%s754_s28] sm:$0x3] }
 0x792   : > { %v589_v49 = vmul.f32 %v586_v47, %v529_v25 }
 0x7ef   : > { %v592_v46 = vpop.permute.xlu0 %591 }
 0x7f0   : > { %v594_v48 = vmul.f32 %v592_v46, %v586_v47 }
 0x7f2   : > { %596 = vrot.lane.b32.xlu1 %v594_v48, %s1160_s16 }
 0x864   : > { %v597_v50 = vpop.permute.xlu1 %596 }
 0x865   : > { %v599_v51 = vadd.f32 %v597_v50, %v589_v49 }
 0x867   : > { %1116 = vtanh.f32 %v599_v51 }
 0x86d   : > { %v1117_v52 = vpop.eup %1116 }
 0x86e   : > { %602 = vrot.lane.b32.xlu2 %v1117_v52, %s1159_s15 }
 0x8c8   : > { %v603_v53 = vpop.permute.xlu2 %602 }
 0x8c9   : > { %v605_v54 = vmul.f32 %v603_v53, %v586_v47 }
 0x8cb   : > { %607 = vrot.lane.b32.xlu0 %v605_v54, %s1160_s16 }
 0x93d   : > { %v608_v55 = vpop.permute.xlu0 %607 }
 0x93e   : > { %611 = vst.msk [vmem:[%s610_s11] sm:$0x3] %vm400_vm5, %v608_v55  ;;  %1058 = vmatmul.msk.f32.vlgmr.msrb.gmra.mxu2 %vm280_vm0, %v608_v55  ;;  %s269_s11 = scalar_lea.vmem %s1376_s5, %s1043_s19 }
 0x9c1   : > { %v635_v57 = vpop.f32.mrf.mxu2 }
 0x9c2   : > { %v638_v58 = vadd.f32 %v635_v57, %v615_v56 }
 0x9c4   : > { %1118 = vtanh.f32 %v638_v58  ;;  %v1059_v60 = vmul.f32 -1.442695, %v638_v58 }
 0x9c6   : > { %1120 = vpow2.f32 %v1059_v60 }
 0x9ca   : > { %v1119_v59 = vpop.eup %1118 }
 0x9cb   : > { %661 = vrot.lane.b32.xlu1 %v1119_v59, %s1159_s15 }
 0x9cc   : > { %v1121_v61 = vpop.eup %1120 }
 0x9cd   : > { %v642_v62 = vadd.f32 1.0, %v1121_v61 }
 0x9cf   : > { %1122 = vrcp.f32 %v642_v62  ;;  %v654_v4 = vand.u32 2147483648, %v642_v62  ;;  %vm648_vm4 = vweird.f32 %v642_v62  ;;  %v652_v5 = vand.u32 2147483647, %v642_v62 }
 0x9d1   : > { %v655_v7 = vor.u32 1.1754944e-38, %v654_v4  ;;  %vm653_vm7 = vcmp.eq.f32.partialorder %v652_v5, 8.507059e+37 }
 0x9d5   : > { %v1123_v63 = vpop.eup %1122 }
 0x9d6   : > { %v644_v0 = vmul.f32 %v1123_v63, %v642_v62  ;;  %vm649_vm3 = vweird.f32 %v1123_v63 }
 0x9d7   : > { %vm650_vm6 = vmor %vm648_vm4, %vm649_vm3 }
 0x9d8   : > { %v645_v1 = vsub.f32 1.0, %v644_v0 }
 0x9da   : > { %v646_v2 = vmul.f32 %v1123_v63, %v645_v1 }
 0x9dc   : > { %v647_v3 = vadd.f32 %v1123_v63, %v646_v2 }
 0x9de   : > { %v651_v6 = vsel %vm650_vm6, %v1123_v63, %v647_v3 }
 0x9df   : > { %v656_v9 = vsel %vm653_vm7, %v655_v7, %v651_v6  ;;  %v825_v6 = vld [vmem:[%s824_s7] sm:$0x3] }
 0x9e0   : > { %v659_v11 = vmul.f32 %v656_v9, %v599_v51 }
 0xa3d   : > { %v662_v8 = vpop.permute.xlu1 %661 }
 0xa3e   : > { %v664_v10 = vmul.f32 %v662_v8, %v656_v9 }
 0xa40   : > { %666 = vrot.lane.b32.xlu2 %v664_v10, %s1160_s16 }
 0xa9a   : > { %v667_v12 = vpop.permute.xlu2 %666 }
 0xa9b   : > { %v669_v13 = vadd.f32 %v667_v12, %v659_v11 }
 0xa9d   : > { %1124 = vtanh.f32 %v669_v13 }
 0xaa3   : > { %v1125_v14 = vpop.eup %1124 }
 0xaa4   : > { %672 = vrot.lane.b32.xlu0 %v1125_v14, %s1159_s15 }
 0xb16   : > { %v673_v15 = vpop.permute.xlu0 %672 }
 0xb17   : > { %v675_v16 = vmul.f32 %v673_v15, %v656_v9 }
 0xb19   : > { %677 = vrot.lane.b32.xlu1 %v675_v16, %s1160_s16 }
 0xb8b   : > { %v678_v17 = vpop.permute.xlu1 %677 }
 0xb8c   : > { %681 = vst.msk [vmem:[%s680_s17] sm:$0x3] %vm400_vm5, %v678_v17  ;;  %1061 = vmatmul.msk.f32.vlgmr.msrb.gmra.mxu3 %vm280_vm0, %v678_v17 }
 0xc0f   : > { %v705_v19 = vpop.f32.mrf.mxu3 }
 0xc10   : > { %v708_v20 = vadd.f32 %v705_v19, %v685_v18 }
 0xc12   : > { %1126 = vtanh.f32 %v708_v20  ;;  %v1062_v22 = vmul.f32 -1.442695, %v708_v20 }
 0xc14   : > { %1128 = vpow2.f32 %v1062_v22 }
 0xc18   : > { %v1127_v21 = vpop.eup %1126 }
 0xc19   : > { %731 = vrot.lane.b32.xlu2 %v1127_v21, %s1159_s15 }
 0xc1a   : > { %v1129_v23 = vpop.eup %1128 }
 0xc1b   : > { %v712_v24 = vadd.f32 1.0, %v1129_v23 }
 0xc1d   : > { %1130 = vrcp.f32 %v712_v24  ;;  %v724_v30 = vand.u32 2147483648, %v712_v24  ;;  %vm718_vm9 = vweird.f32 %v712_v24  ;;  %v722_v31 = vand.u32 2147483647, %v712_v24 }
 0xc1f   : > { %v725_v33 = vor.u32 1.1754944e-38, %v724_v30  ;;  %vm723_vm11 = vcmp.eq.f32.partialorder %v722_v31, 8.507059e+37 }
 0xc23   : > { %v1131_v25 = vpop.eup %1130 }
 0xc24   : > { %v714_v26 = vmul.f32 %v1131_v25, %v712_v24  ;;  %vm719_vm8 = vweird.f32 %v1131_v25 }
 0xc25   : > { %vm720_vm10 = vmor %vm718_vm9, %vm719_vm8 }
 0xc26   : > { %v715_v27 = vsub.f32 1.0, %v714_v26 }
 0xc28   : > { %v716_v28 = vmul.f32 %v1131_v25, %v715_v27 }
 0xc2a   : > { %v717_v29 = vadd.f32 %v1131_v25, %v716_v28 }
 0xc2c   : > { %v721_v32 = vsel %vm720_vm10, %v1131_v25, %v717_v29 }
 0xc2d   : > { %v726_v35 = vsel %vm723_vm11, %v725_v33, %v721_v32 }
 0xc2e   : > { %v729_v37 = vmul.f32 %v726_v35, %v669_v13 }
 0xc73   : > { %v732_v34 = vpop.permute.xlu2 %731 }
 0xc74   : > { %v734_v36 = vmul.f32 %v732_v34, %v726_v35 }
 0xc76   : > { %736 = vrot.lane.b32.xlu0 %v734_v36, %s1160_s16 }
 0xce8   : > { %v737_v38 = vpop.permute.xlu0 %736 }
 0xce9   : > { %v739_v39 = vadd.f32 %v737_v38, %v729_v37 }
 0xceb   : > { %1132 = vtanh.f32 %v739_v39 }
 0xcf1   : > { %v1133_v40 = vpop.eup %1132 }
 0xcf2   : > { %742 = vrot.lane.b32.xlu1 %v1133_v40, %s1159_s15 }
 0xd64   : > { %v743_v41 = vpop.permute.xlu1 %742 }
 0xd65   : > { %v745_v42 = vmul.f32 %v743_v41, %v726_v35 }
 0xd67   : > { %747 = vrot.lane.b32.xlu2 %v745_v42, %s1160_s16 }
 0xdc1   : > { %v748_v43 = vpop.permute.xlu2 %747 }
 0xdc2   : > { %751 = vst.msk [vmem:[%s750_s25] sm:$0x3] %vm400_vm5, %v748_v43  ;;  %1064 = vmatmul.msk.f32.vlgmr.msrb.gmra.mxu0 %vm280_vm0, %v748_v43 }
 0xe3f   : > { %v775_v45 = vpop.f32.mrf.mxu0 }
 0xe40   : > { %v778_v46 = vadd.f32 %v775_v45, %v755_v44 }
 0xe42   : > { %1134 = vtanh.f32 %v778_v46  ;;  %v1065_v48 = vmul.f32 -1.442695, %v778_v46 }
 0xe44   : > { %1136 = vpow2.f32 %v1065_v48 }
 0xe48   : > { %v1135_v47 = vpop.eup %1134 }
 0xe49   : > { %801 = vrot.lane.b32.xlu0 %v1135_v47, %s1159_s15 }
 0xe4a   : > { %v1137_v49 = vpop.eup %1136 }
 0xe4b   : > { %v782_v50 = vadd.f32 1.0, %v1137_v49 }
 0xe4d   : > { %1138 = vrcp.f32 %v782_v50  ;;  %v794_v56 = vand.u32 2147483648, %v782_v50  ;;  %vm788_vm13 = vweird.f32 %v782_v50  ;;  %v792_v57 = vand.u32 2147483647, %v782_v50 }
 0xe4f   : > { %v795_v59 = vor.u32 1.1754944e-38, %v794_v56  ;;  %vm793_vm15 = vcmp.eq.f32.partialorder %v792_v57, 8.507059e+37 }
 0xe53   : > { %v1139_v51 = vpop.eup %1138 }
 0xe54   : > { %v784_v52 = vmul.f32 %v1139_v51, %v782_v50  ;;  %vm789_vm12 = vweird.f32 %v1139_v51 }
 0xe55   : > { %vm790_vm14 = vmor %vm788_vm13, %vm789_vm12 }
 0xe56   : > { %v785_v53 = vsub.f32 1.0, %v784_v52 }
 0xe58   : > { %v786_v54 = vmul.f32 %v1139_v51, %v785_v53 }
 0xe5a   : > { %v787_v55 = vadd.f32 %v1139_v51, %v786_v54 }
 0xe5c   : > { %v791_v58 = vsel %vm790_vm14, %v1139_v51, %v787_v55 }
 0xe5d   : > { %v796_v61 = vsel %vm793_vm15, %v795_v59, %v791_v58 }
 0xe5e   : > { %v799_v63 = vmul.f32 %v796_v61, %v739_v39 }
 0xebb   : > { %v802_v60 = vpop.permute.xlu0 %801 }
 0xebc   : > { %v804_v62 = vmul.f32 %v802_v60, %v796_v61 }
 0xebe   : > { %806 = vrot.lane.b32.xlu1 %v804_v62, %s1160_s16 }
 0xf30   : > { %v807_v0 = vpop.permute.xlu1 %806 }
 0xf31   : > { %v809_v1 = vadd.f32 %v807_v0, %v799_v63 }
 0xf33   : > { %1140 = vtanh.f32 %v809_v1 }
 0xf39   : > { %v1141_v2 = vpop.eup %1140 }
 0xf3a   : > { %812 = vrot.lane.b32.xlu2 %v1141_v2, %s1159_s15 }
 0xf94   : > { %v813_v3 = vpop.permute.xlu2 %812 }
 0xf95   : > { %v815_v4 = vmul.f32 %v813_v3, %v796_v61 }
 0xf97   : > { %817 = vrot.lane.b32.xlu0 %v815_v4, %s1160_s16 }
0x1009   : > { %v818_v5 = vpop.permute.xlu0 %817 }
0x100a   : > { %821 = vst.msk [vmem:[%s820_s29] sm:$0x3] %vm400_vm5, %v818_v5  ;;  %1067 = vmatmul.msk.f32.vlgmr.msra.gmra.mxu1 %vm280_vm0, %v818_v5 }
0x1087   : > { %v845_v7 = vpop.f32.mrf.mxu1 }
0x1088   : > { %v848_v8 = vadd.f32 %v845_v7, %v825_v6 }
0x108a   : > { %1142 = vtanh.f32 %v848_v8  ;;  %v1068_v10 = vmul.f32 -1.442695, %v848_v8 }
0x108c   : > { %1144 = vpow2.f32 %v1068_v10 }
0x1090   : > { %v1143_v9 = vpop.eup %1142 }
0x1091   : > { %871 = vrot.lane.b32.xlu1 %v1143_v9, %s1159_s15 }
0x1092   : > { %v1145_v11 = vpop.eup %1144 }
0x1093   : > { %v852_v12 = vadd.f32 1.0, %v1145_v11 }
0x1095   : > { %1146 = vrcp.f32 %v852_v12  ;;  %v864_v18 = vand.u32 2147483648, %v852_v12  ;;  %vm858_vm1 = vweird.f32 %v852_v12  ;;  %v862_v19 = vand.u32 2147483647, %v852_v12 }
0x1097   : > { %v865_v21 = vor.u32 1.1754944e-38, %v864_v18  ;;  %vm863_vm3 = vcmp.eq.f32.partialorder %v862_v19, 8.507059e+37 }
0x109b   : > { %v1147_v13 = vpop.eup %1146 }
0x109c   : > { %v854_v14 = vmul.f32 %v1147_v13, %v852_v12  ;;  %vm859_vm0 = vweird.f32 %v1147_v13 }
0x109d   : > { %vm860_vm2 = vmor %vm858_vm1, %vm859_vm0 }
0x109e   : > { %v855_v15 = vsub.f32 1.0, %v854_v14 }
0x10a0   : > { %v856_v16 = vmul.f32 %v1147_v13, %v855_v15 }
0x10a2   : > { %v857_v17 = vadd.f32 %v1147_v13, %v856_v16 }
0x10a4   : > { %v861_v20 = vsel %vm860_vm2, %v1147_v13, %v857_v17 }
0x10a5   : > { %v866_v23 = vsel %vm863_vm3, %v865_v21, %v861_v20 }
0x10a6   : > { %v869_v25 = vmul.f32 %v866_v23, %v809_v1 }
0x1103   : > { %v872_v22 = vpop.permute.xlu1 %871 }
0x1104   : > { %v874_v24 = vmul.f32 %v872_v22, %v866_v23 }
0x1106   : > { %876 = vrot.lane.b32.xlu2 %v874_v24, %s1160_s16 }
0x1160   : > { %v877_v26 = vpop.permute.xlu2 %876 }
0x1161   : > { %v879_v27 = vadd.f32 %v877_v26, %v869_v25 }
0x1163   : > { %1148 = vtanh.f32 %v879_v27 }
0x1169   : > { %v1149_v28 = vpop.eup %1148 }
0x116a   : > { %882 = vrot.lane.b32.xlu0 %v1149_v28, %s1159_s15 }
0x11dc   : > { %v883_v29 = vpop.permute.xlu0 %882 }
0x11dd   : > { %v885_v30 = vmul.f32 %v883_v29, %v866_v23 }
0x11df   : > { %887 = vrot.lane.b32.xlu1 %v885_v30, %s1160_s16 }
0x1251   : > { %v888_v31 = vpop.permute.xlu1 %887 }
0x1252   : > { %891 = vst.msk [vmem:[%s890_s8] sm:$0x3] %vm400_vm5, %v888_v31 }
0x1253   : > { %892 = vst.msk [vmem:[%s269_s11] sm:$0x3] %vm400_vm5, %v888_v31 }
0x1254 PF: > { %s16_s18 = sadd.s32 1, %s1156_s18  }
0x1255   : > { %p13_p5 = scmp.ge.s32.totalorder %s16_s18, 4  }
0x1257   :  { %15 = sbr.rel (!%p13_p5) target bundleno = 1 (0x1), region = 107 }

// kernel: text_rnn_forward.4
= control target key start
LH: loop header
LB: loop body
LE: loop exit
PB: predicated region body
PF: predicated region fallthrough
CT: control target
= control target key end

     0   :  { %11 = vsyncpa [#allocation4], 0  ;;  %s1609_s0 = inlined_call_operand.vmem [shape: f32[16,64], index: 0, kind: input, shape index: {}]   ;;  %s1610_s1 = inlined_call_operand.vmem [shape: f32[2,64,128], index: 1, kind: input, shape index: {}]   ;;  %s1611_s2 = inlined_call_operand.vmem [shape: f32[2,32,128], index: 2, kind: input, shape index: {}]   ;;  %s1612_s3 = inlined_call_operand.vmem [shape: f32[2,1,128], index: 3, kind: input, shape index: {}]   ;;  %s1613_s4 = inlined_call_operand.hbm [shape: f32[2,8,2,32], index: 4, kind: output, shape index: {0}]   ;;  %s1614_s5 = inlined_call_operand.vmem [shape: f32[2,2,32], index: 5, kind: output, shape index: {1}]  }
   0x1   :  { %13 = vsyncpa [#allocation4 + $0x1], 0  ;;  %s1307_s18 = smov 0   ;;  %s1309_s19 = smov 0  }
   0x2   :  { %s1311_s20 = smov 0   ;;  %s1313_s21 = smov 0  }
   0x3 LB: > { %s1328_s22 = sadd.s32 4294967295, %s1271_s21   ;;  %s1058_s23 = sadd.s32 4294967294, %s1271_s21   ;;  %s1271_s21 = sphi %s1313_s21, %s1622_s21   ;;  %s1267_s20 = sphi %s1311_s20, %s1621_s20   ;;  %s1263_s19 = sphi %s1309_s19, %s1620_s19   ;;  %s1259_s18 = sphi %s1307_s18, %s1619_s18  }
   0x4   : > { %s1332_s24 = sadd.s32 1, %s1271_s21   ;;  %s125_s25 = sadd.s32 1, %s1267_s20 }
   0x5   : > { %s122_s26 = ssub.s32 %s1271_s21, %s1332_s24  ;;  %p135_p0 = scmp.ne.s32.totalorder %s1267_s20, %s1263_s19 }
   0x6   : > { %p123_p1 = scmp.eq.s32.totalorder %s122_s26, 0  ;;  %p136_p2 = scmp.eq.s32.totalorder %s1328_s22, 1 }
   0x7   : > { %p141_p3 = scmp.ne.s32.totalorder %s1263_s19, %s1259_s18  ;;  %p142_p4 = scmp.eq.s32.totalorder %s1058_s23, 1 }
   0x8   : > { %s1343_s27 = scalar_select %p123_p1, %s1267_s20, %s125_s25  }
   0x9   : > { %p1347_p5 = por %p136_p2, %p135_p0  ;;  %p1351_p6 = por %p142_p4, %p141_p3 }
   0xa   : > { %p1061_p7 = scmp.ge.s32.totalorder %s1271_s21, 1  ;;  %p211_p8 = scmp.lt.s32.totalorder %s1271_s21, 3 }
   0xc   : > { %p212_p9 = pnand %p1061_p7, %p211_p8 }
   0xd   : > { %p251_p10 = scmp.lt.s32.totalorder (!%p212_p9), %s1328_s22, 1  ;;  %s1274_s11 = smov (!%p212_p9), 64  }
   0xe   : > { %215 = sbr.rel (%p212_p9) target bundleno = 4717 (0x126d), region = 36  ;;  %s1275_s12 = smov (!%p212_p9), 32  }
  0x13   : > { %s1359_s30 = scalar_select %p251_p10, %s1328_s22, 1  ;;  %v1273_v11 = vmov 0.0   ;;  %v268_v13 = vld [vmem:[%s1609_s0] sm:$0xff]  ;;  %vm282_vm0 = vcmask 523264   ;;  %v269_v14 = vld [vmem:[%s1609_s0 + $0x8] sm:$0xff]  ;;  %vm403_vm5 = vcmask 254976  }
  0x14   : > { %s1434_s8 = scalar_select %p136_p2, 7, 0  ;;  %vm336_vm6 = vcmask 261120  }
  0x15   : > { %s1098_s6 = sshll.u32 %s1359_s30, 6  ;;  %s1099_s7 = sshll.u32 %s1359_s30, 5 }
  0x16   : > { %s1366_s10 = scalar_lea.vmem %s1610_s1, %s1098_s6  ;;  %s260_s13 = scalar_lea.vmem %s1611_s2, %s1099_s7 }
  0x17   : > { %v277_v0 = vld [vmem:[%s1366_s10 + $0x38] sm:$0xff]  ;;  %v276_v1 = vld [vmem:[%s1366_s10 + $0x30] sm:$0xff]  ;;  %v275_v2 = vld [vmem:[%s1366_s10 + $0x28] sm:$0xff]  ;;  %s263_s16 = scalar_lea.vmem %s1612_s3, %s1359_s30  ;;  %s1070_s9 = sshll.u32 %s1434_s8, 1 }
  0x18   : > { %297 = vmatpush.msra.mxu0 %v277_v0  ;;  %v1374_v3 = vld [vmem:[%s260_s13 + $0x18] sm:$0xff]  ;;  %v1377_v4 = vld [vmem:[%s260_s13 + $0x10] sm:$0xff]  ;;  %v274_v5 = vld [vmem:[%s1366_s10 + $0x20] sm:$0xff]  ;;  %s1459_s17 = scalar_select %p136_p2, 6, 1 }
  0x19   : > { %352 = vmatpush.msra.mxu1 %v1374_v3  ;;  %v1384_v6 = vld [vmem:[%s260_s13 + $0x8] sm:$0xff]  ;;  %423 = vmatpush.msra.mxu2 %v1374_v3  ;;  %v273_v7 = vld [vmem:[%s1366_s10 + $0x18] sm:$0xff]  ;;  %v1390_v8 = vld [vmem:[%s260_s13] sm:$0xff]  ;;  %s1615_s13 = sand.u32 1, %s1263_s19  }
  0x1a   : > { %298 = vmatpush.msra.mxu0 %v276_v1  ;;  %493 = vmatpush.msra.mxu3 %v1374_v3  ;;  %v272_v9 = vld [vmem:[%s1366_s10 + $0x10] sm:$0xff]  ;;  %v271_v10 = vld [vmem:[%s1366_s10 + $0x8] sm:$0xff]  ;;  %v270_v12 = vld [vmem:[%s1366_s10] sm:$0xff]  ;;  %s334_s10 = scalar_lea.vmem [#allocation2], %s1070_s9  ;;  %s1062_s14 = sshll.u32 %s1615_s13, 4 }
  0x1b   : > { %353 = vmatpush.msra.mxu1 %v1377_v4  ;;  %424 = vmatpush.msra.mxu2 %v1377_v4  ;;  %v1144_v15 = vld [vmem:[%s263_s16] ss:$0 sm:$0xff]  ;;  %s1446_s15 = scalar_lea.vmem [#allocation3], %s1062_s14  ;;  %s1072_s23 = sshll.u32 %s1459_s17, 1 }
  0x1c   : > { %299 = vmatpush.msra.mxu0 %v275_v2  ;;  %494 = vmatpush.msra.mxu3 %v1377_v4  ;;  %s402_s16 = scalar_lea.vmem %s1446_s15, %s1070_s9 [#allocation3]  ;;  %s407_s25 = scalar_lea.vmem [#allocation2], %s1072_s23 }
  0x1d   : > { %354 = vmatpush.msra.mxu1 %v1384_v6  ;;  %425 = vmatpush.msra.mxu2 %v1384_v6  ;;  %s473_s26 = scalar_lea.vmem %s1446_s15, %s1072_s23 [#allocation3]  ;;  %s1229_s13 = scalar_lea.hbm %s1613_s4, 32 }
  0x1e   : > { %300 = vmatpush.msra.mxu0 %v274_v5  ;;  %495 = vmatpush.msra.mxu3 %v1384_v6  ;;  %s1475_s6 = scalar_select %p136_p2, 5, 2 }
  0x1f   : > { %355 = vmatpush.msra.mxu1 %v1390_v8  ;;  %426 = vmatpush.msra.mxu2 %v1390_v8  ;;  %s1507_s23 = scalar_select %p136_p2, 3, 4 }
  0x20   : > { %301 = vmatpush.msra.mxu0 %v273_v7  ;;  %356 = vmatmul.f32.vlgmr.msra.gmra.mxu1 %v1273_v11  ;;  %s1075_s7 = sshll.u32 %s1475_s6, 1 }
  0x21   : > { %496 = vmatpush.msra.mxu3 %v1390_v8  ;;  %563 = vmatpush.msrb.mxu1 %v1374_v3  ;;  %s477_s8 = scalar_lea.vmem [#allocation2], %s1075_s7  ;;  %s543_s9 = scalar_lea.vmem %s1446_s15, %s1075_s7 [#allocation3] }
  0x22   : > { %302 = vmatpush.msra.mxu0 %v272_v9  ;;  %633 = vmatpush.msrb.mxu2 %v1374_v3  ;;  %s1523_s7 = scalar_select %p136_p2, 2, 5 }
  0x23   : > { %703 = vmatpush.msrb.mxu3 %v1374_v3  ;;  %564 = vmatpush.msrb.mxu1 %v1377_v4 }
  0x24   : > { %303 = vmatpush.msra.mxu0 %v271_v10  ;;  %634 = vmatpush.msrb.mxu2 %v1377_v4 }
  0x25   : > { %704 = vmatpush.msrb.mxu3 %v1377_v4  ;;  %565 = vmatpush.msrb.mxu1 %v1384_v6 }
  0x26   : > { %304 = vmatpush.msra.mxu0 %v270_v12  ;;  %635 = vmatpush.msrb.mxu2 %v1384_v6 }
  0x27   : > { %1068 = vmatmul.msk.f32.vlgmr.msra.gmra.mxu0 %vm282_vm0, %v268_v13  ;;  %705 = vmatpush.msrb.mxu3 %v1384_v6 }
  0x28   : > { %566 = vmatpush.msrb.mxu1 %v1390_v8  ;;  %636 = vmatpush.msrb.mxu2 %v1390_v8 }
  0x29   : > { %706 = vmatpush.msrb.mxu3 %v1390_v8 }
  0x2a   : > { %773 = vmatpush.msra.mxu1 %v1374_v3 }
  0x2c   : > { %774 = vmatpush.msra.mxu1 %v1377_v4 }
  0x2e   : > { %775 = vmatpush.msra.mxu1 %v1384_v6 }
  0x2f   : > { %1069 = vmatmul.msk.f32.gmra.mxu0 %vm282_vm0, %v269_v14 }
  0x30   : > { %776 = vmatpush.msra.mxu1 %v1390_v8 }
  0x9d   : > { %v357_v20 = vpop.f32.mrf.mxu1 }
  0xa4   : > { %v306_v16 = vpop.f32.mrf.mxu0 }
  0xa5   : > { %v307_v17 = vadd.f32 %v1144_v15, %v306_v16 }
  0xa7   : > { %312 = vst [vmem:[#allocation2] sm:$0xf] %v307_v17  }
  0xa8   : > { %316 = vst [vmem:[#allocation2] sm:$0xf0] %v307_v17  }
  0xac   : > { %v309_v18 = vpop.f32.mrf.mxu0 }
  0xad   : > { %v310_v19 = vadd.f32 %v1144_v15, %v309_v18 }
  0xaf   : > { %320 = vst [vmem:[#allocation2 + $0x8] sm:$0xf] %v310_v19  }
  0xb0   : > { %324 = vst [vmem:[#allocation2 + $0x8] sm:$0xf0] %v310_v19  }
  0xb7   : > { %v335_v21 = vld [vmem:[%s334_s10] sm:$0x3]  ;;  %s1491_s10 = scalar_select %p136_p2, 4, 3 }
  0xb8   : > { %v360_v22 = vadd.f32 %v357_v20, %v335_v21  ;;  %v408_v46 = vld [vmem:[%s407_s25] sm:$0x3]  ;;  %s1081_s25 = sshll.u32 %s1507_s23, 1 }
  0xb9   : > { %s1078_s14 = sshll.u32 %s1491_s10, 1  ;;  %s683_s6 = scalar_lea.vmem %s1446_s15, %s1081_s25 [#allocation3] }
  0xba   : > { %1145 = vtanh.f32 %v360_v22  ;;  %v1071_v24 = vmul.f32 -1.442695, %v360_v22  ;;  %s613_s17 = scalar_lea.vmem %s1446_s15, %s1078_s14 [#allocation3] }
  0xbc   : > { %1147 = vpow2.f32 %v1071_v24 }
  0xc0   : > { %v1146_v23 = vpop.eup %1145 }
  0xc1   : > { %383 = vrot.lane.b32.xlu0 %v1146_v23, %s1274_s11 }
  0xc2   : > { %v1148_v25 = vpop.eup %1147 }
  0xc3   : > { %v364_v26 = vadd.f32 1.0, %v1148_v25 }
  0xc5   : > { %1149 = vrcp.f32 %v364_v26  ;;  %v376_v32 = vand.u32 2147483648, %v364_v26  ;;  %vm370_vm2 = vweird.f32 %v364_v26  ;;  %v374_v33 = vand.u32 2147483647, %v364_v26 }
  0xc7   : > { %v377_v35 = vor.u32 1.1754944e-38, %v376_v32  ;;  %vm375_vm4 = vcmp.eq.f32.partialorder %v374_v33, 8.507059e+37 }
  0xcb   : > { %v1150_v27 = vpop.eup %1149 }
  0xcc   : > { %v366_v28 = vmul.f32 %v1150_v27, %v364_v26  ;;  %vm371_vm1 = vweird.f32 %v1150_v27 }
  0xcd   : > { %vm372_vm3 = vmor %vm370_vm2, %vm371_vm1 }
  0xce   : > { %v367_v29 = vsub.f32 1.0, %v366_v28 }
  0xd0   : > { %v368_v30 = vmul.f32 %v1150_v27, %v367_v29 }
  0xd2   : > { %v369_v31 = vadd.f32 %v1150_v27, %v368_v30 }
  0xd4   : > { %v373_v34 = vsel %vm372_vm3, %v1150_v27, %v369_v31 }
  0xd5   : > { %v378_v37 = vsel %vm375_vm4, %v377_v35, %v373_v34 }
  0xd6   : > { %v381_v39 = vmul.f32 0.0, %v378_v37 }
 0x133   : > { %v384_v36 = vpop.permute.xlu0 %383 }
 0x134   : > { %v386_v38 = vmul.f32 %v384_v36, %v378_v37 }
 0x136   : > { %388 = vrot.lane.b32.xlu0 %v386_v38, %s1275_s12 }
 0x1a8   : > { %v389_v40 = vpop.permute.xlu0 %388 }
 0x1a9   : > { %v391_v41 = vadd.f32 %v389_v40, %v381_v39 }
 0x1ab   : > { %1151 = vtanh.f32 %v391_v41 }
 0x1b1   : > { %v1152_v42 = vpop.eup %1151 }
 0x1b2   : > { %394 = vrot.lane.b32.xlu1 %v1152_v42, %s1274_s11 }
 0x224   : > { %v395_v43 = vpop.permute.xlu1 %394 }
 0x225   : > { %v397_v44 = vmul.f32 %v395_v43, %v378_v37 }
 0x227   : > { %399 = vrot.lane.b32.xlu1 %v397_v44, %s1275_s12 }
 0x299   : > { %v400_v45 = vpop.permute.xlu1 %399 }
 0x29a   : > { %404 = vst.msk [vmem:[%s402_s16] sm:$0x3] %vm403_vm5, %v400_v45  ;;  %1073 = vmatmul.msk.f32.vlgmr.msra.gmra.mxu2 %vm336_vm6, %v400_v45  ;;  %s547_s16 = scalar_lea.vmem [#allocation2], %s1078_s14 }
 0x29b   : > { %843 = vmatpush.msra.mxu2 %v1374_v3  ;;  %v548_v34 = vld [vmem:[%s547_s16] sm:$0x3]  ;;  %s1539_s14 = scalar_select %p136_p2, 1, 6 }
 0x29d   : > { %844 = vmatpush.msra.mxu2 %v1377_v4  ;;  %s1087_s16 = sshll.u32 %s1539_s14, 1  ;;  %s1067_s14 = sshll.u32 %s1359_s30, 1 }
 0x29e   : > { %s823_s23 = scalar_lea.vmem %s1446_s15, %s1087_s16 [#allocation3] }
 0x29f   : > { %845 = vmatpush.msra.mxu2 %v1384_v6 }
 0x2a1   : > { %846 = vmatpush.msra.mxu2 %v1390_v8  ;;  %v478_v8 = vld [vmem:[%s477_s8] sm:$0x3]  ;;  %s1084_s8 = sshll.u32 %s1523_s7, 1  ;;  %s1100_s7 = sshll.u32 %s1328_s22, 4 }
 0x2a2   : > { %s753_s10 = scalar_lea.vmem %s1446_s15, %s1084_s8 [#allocation3]  ;;  %s1618_s22 = sand.u32 1, %s1263_s19  }
 0x31d   : > { %v428_v47 = vpop.f32.mrf.mxu2 }
 0x31e   : > { %v431_v48 = vadd.f32 %v428_v47, %v408_v46 }
 0x320   : > { %1153 = vtanh.f32 %v431_v48  ;;  %v1074_v50 = vmul.f32 -1.442695, %v431_v48 }
 0x322   : > { %1155 = vpow2.f32 %v1074_v50 }
 0x326   : > { %v1154_v49 = vpop.eup %1153 }
 0x327   : > { %454 = vrot.lane.b32.xlu2 %v1154_v49, %s1274_s11 }
 0x328   : > { %v1156_v51 = vpop.eup %1155 }
 0x329   : > { %v435_v52 = vadd.f32 1.0, %v1156_v51 }
 0x32b   : > { %1157 = vrcp.f32 %v435_v52  ;;  %v447_v58 = vand.u32 2147483648, %v435_v52  ;;  %vm441_vm8 = vweird.f32 %v435_v52  ;;  %v445_v59 = vand.u32 2147483647, %v435_v52 }
 0x32d   : > { %v448_v61 = vor.u32 1.1754944e-38, %v447_v58  ;;  %vm446_vm10 = vcmp.eq.f32.partialorder %v445_v59, 8.507059e+37 }
 0x331   : > { %v1158_v53 = vpop.eup %1157 }
 0x332   : > { %v437_v54 = vmul.f32 %v1158_v53, %v435_v52  ;;  %vm442_vm7 = vweird.f32 %v1158_v53 }
 0x333   : > { %vm443_vm9 = vmor %vm441_vm8, %vm442_vm7 }
 0x334   : > { %v438_v55 = vsub.f32 1.0, %v437_v54 }
 0x336   : > { %v439_v56 = vmul.f32 %v1158_v53, %v438_v55 }
 0x338   : > { %v440_v57 = vadd.f32 %v1158_v53, %v439_v56 }
 0x33a   : > { %v444_v60 = vsel %vm443_vm9, %v1158_v53, %v440_v57 }
 0x33b   : > { %v449_v63 = vsel %vm446_vm10, %v448_v61, %v444_v60 }
 0x33c   : > { %v452_v1 = vmul.f32 %v449_v63, %v391_v41 }
 0x381   : > { %v455_v62 = vpop.permute.xlu2 %454 }
 0x382   : > { %v457_v0 = vmul.f32 %v455_v62, %v449_v63 }
 0x384   : > { %459 = vrot.lane.b32.xlu2 %v457_v0, %s1275_s12 }
 0x3de   : > { %v460_v2 = vpop.permute.xlu2 %459 }
 0x3df   : > { %v462_v3 = vadd.f32 %v460_v2, %v452_v1 }
 0x3e1   : > { %1159 = vtanh.f32 %v462_v3 }
 0x3e7   : > { %v1160_v4 = vpop.eup %1159 }
 0x3e8   : > { %465 = vrot.lane.b32.xlu0 %v1160_v4, %s1274_s11 }
 0x45a   : > { %v466_v5 = vpop.permute.xlu0 %465 }
 0x45b   : > { %v468_v6 = vmul.f32 %v466_v5, %v449_v63 }
 0x45d   : > { %470 = vrot.lane.b32.xlu1 %v468_v6, %s1275_s12 }
 0x4cf   : > { %v471_v7 = vpop.permute.xlu1 %470 }
 0x4d0   : > { %474 = vst.msk [vmem:[%s473_s26] sm:$0x3] %vm403_vm5, %v471_v7  ;;  %1076 = vmatmul.msk.f32.vlgmr.msra.gmra.mxu3 %vm336_vm6, %v471_v7  ;;  %s617_s26 = scalar_lea.vmem [#allocation2], %s1081_s25 }
 0x4d1   : > { %v618_v60 = vld [vmem:[%s617_s26] sm:$0x3]  ;;  %s1555_s25 = scalar_select %p136_p2, 0, 7 }
 0x4d3   : > { %s1090_s26 = sshll.u32 %s1555_s25, 1 }
 0x553   : > { %v498_v9 = vpop.f32.mrf.mxu3 }
 0x554   : > { %v501_v10 = vadd.f32 %v498_v9, %v478_v8 }
 0x556   : > { %1161 = vtanh.f32 %v501_v10  ;;  %v1077_v12 = vmul.f32 -1.442695, %v501_v10 }
 0x558   : > { %1163 = vpow2.f32 %v1077_v12 }
 0x55c   : > { %v1162_v11 = vpop.eup %1161 }
 0x55d   : > { %524 = vrot.lane.b32.xlu2 %v1162_v11, %s1274_s11 }
 0x55e   : > { %v1164_v13 = vpop.eup %1163 }
 0x55f   : > { %v505_v14 = vadd.f32 1.0, %v1164_v13 }
 0x561   : > { %1165 = vrcp.f32 %v505_v14  ;;  %v517_v20 = vand.u32 2147483648, %v505_v14  ;;  %vm511_vm12 = vweird.f32 %v505_v14  ;;  %v515_v21 = vand.u32 2147483647, %v505_v14 }
 0x563   : > { %v518_v23 = vor.u32 1.1754944e-38, %v517_v20  ;;  %vm516_vm14 = vcmp.eq.f32.partialorder %v515_v21, 8.507059e+37 }
 0x567   : > { %v1166_v15 = vpop.eup %1165 }
 0x568   : > { %v507_v16 = vmul.f32 %v1166_v15, %v505_v14  ;;  %vm512_vm11 = vweird.f32 %v1166_v15 }
 0x569   : > { %vm513_vm13 = vmor %vm511_vm12, %vm512_vm11 }
 0x56a   : > { %v508_v17 = vsub.f32 1.0, %v507_v16 }
 0x56c   : > { %v509_v18 = vmul.f32 %v1166_v15, %v508_v17 }
 0x56e   : > { %v510_v19 = vadd.f32 %v1166_v15, %v509_v18 }
 0x570   : > { %v514_v22 = vsel %vm513_vm13, %v1166_v15, %v510_v19 }
 0x571   : > { %v519_v25 = vsel %vm516_vm14, %v518_v23, %v514_v22 }
 0x572   : > { %v522_v27 = vmul.f32 %v519_v25, %v462_v3 }
 0x5b7   : > { %v525_v24 = vpop.permute.xlu2 %524 }
 0x5b8   : > { %v527_v26 = vmul.f32 %v525_v24, %v519_v25 }
 0x5ba   : > { %529 = vrot.lane.b32.xlu0 %v527_v26, %s1275_s12 }
 0x62c   : > { %v530_v28 = vpop.permute.xlu0 %529 }
 0x62d   : > { %v532_v29 = vadd.f32 %v530_v28, %v522_v27 }
 0x62f   : > { %1167 = vtanh.f32 %v532_v29 }
 0x635   : > { %v1168_v30 = vpop.eup %1167 }
 0x636   : > { %535 = vrot.lane.b32.xlu1 %v1168_v30, %s1274_s11 }
 0x6a8   : > { %v536_v31 = vpop.permute.xlu1 %535 }
 0x6a9   : > { %v538_v32 = vmul.f32 %v536_v31, %v519_v25 }
 0x6ab   : > { %540 = vrot.lane.b32.xlu2 %v538_v32, %s1275_s12 }
 0x705   : > { %v541_v33 = vpop.permute.xlu2 %540 }
 0x706   : > { %544 = vst.msk [vmem:[%s543_s9] sm:$0x3] %vm403_vm5, %v541_v33  ;;  %1079 = vmatmul.msk.f32.vlgmr.msrb.gmra.mxu1 %vm336_vm6, %v541_v33  ;;  %s687_s9 = scalar_lea.vmem [#allocation2], %s1084_s8  ;;  %s897_s8 = scalar_lea.sflag [#allocation4], %s1618_s22 }
 0x707   : > { %v688_v22 = vld [vmem:[%s687_s9] sm:$0x3] }
 0x783   : > { %v568_v35 = vpop.f32.mrf.mxu1 }
 0x784   : > { %v571_v36 = vadd.f32 %v568_v35, %v548_v34 }
 0x786   : > { %1169 = vtanh.f32 %v571_v36  ;;  %v1080_v38 = vmul.f32 -1.442695, %v571_v36 }
 0x788   : > { %1171 = vpow2.f32 %v1080_v38 }
 0x78c   : > { %v1170_v37 = vpop.eup %1169 }
 0x78d   : > { %594 = vrot.lane.b32.xlu0 %v1170_v37, %s1274_s11 }
 0x78e   : > { %v1172_v39 = vpop.eup %1171 }
 0x78f   : > { %v575_v40 = vadd.f32 1.0, %v1172_v39 }
 0x791   : > { %1173 = vrcp.f32 %v575_v40  ;;  %v587_v46 = vand.u32 2147483648, %v575_v40  ;;  %vm581_vm0 = vweird.f32 %v575_v40  ;;  %v585_v47 = vand.u32 2147483647, %v575_v40 }
 0x793   : > { %v588_v49 = vor.u32 1.1754944e-38, %v587_v46  ;;  %vm586_vm2 = vcmp.eq.f32.partialorder %v585_v47, 8.507059e+37 }
 0x797   : > { %v1174_v41 = vpop.eup %1173 }
 0x798   : > { %v577_v42 = vmul.f32 %v1174_v41, %v575_v40  ;;  %vm582_vm15 = vweird.f32 %v1174_v41 }
 0x799   : > { %vm583_vm1 = vmor %vm581_vm0, %vm582_vm15 }
 0x79a   : > { %v578_v43 = vsub.f32 1.0, %v577_v42 }
 0x79c   : > { %v579_v44 = vmul.f32 %v1174_v41, %v578_v43 }
 0x79e   : > { %v580_v45 = vadd.f32 %v1174_v41, %v579_v44 }
 0x7a0   : > { %v584_v48 = vsel %vm583_vm1, %v1174_v41, %v580_v45 }
 0x7a1   : > { %v589_v51 = vsel %vm586_vm2, %v588_v49, %v584_v48 }
 0x7a2   : > { %v592_v53 = vmul.f32 %v589_v51, %v532_v29 }
 0x7ff   : > { %v595_v50 = vpop.permute.xlu0 %594 }
 0x800   : > { %v597_v52 = vmul.f32 %v595_v50, %v589_v51 }
 0x802   : > { %599 = vrot.lane.b32.xlu1 %v597_v52, %s1275_s12 }
 0x874   : > { %v600_v54 = vpop.permute.xlu1 %599 }
 0x875   : > { %v602_v55 = vadd.f32 %v600_v54, %v592_v53 }
 0x877   : > { %1175 = vtanh.f32 %v602_v55 }
 0x87d   : > { %v1176_v56 = vpop.eup %1175 }
 0x87e   : > { %605 = vrot.lane.b32.xlu2 %v1176_v56, %s1274_s11 }
 0x8d8   : > { %v606_v57 = vpop.permute.xlu2 %605 }
 0x8d9   : > { %v608_v58 = vmul.f32 %v606_v57, %v589_v51 }
 0x8db   : > { %610 = vrot.lane.b32.xlu0 %v608_v58, %s1275_s12 }
 0x94d   : > { %v611_v59 = vpop.permute.xlu0 %610 }
 0x94e   : > { %614 = vst.msk [vmem:[%s613_s17] sm:$0x3] %vm403_vm5, %v611_v59  ;;  %1082 = vmatmul.msk.f32.vlgmr.msrb.gmra.mxu2 %vm336_vm6, %v611_v59  ;;  %s757_s17 = scalar_lea.vmem [#allocation2], %s1087_s16  ;;  %s913_s16 = sshll.u32 %s1446_s15, 4  ;;  %s914_s16 = int_to_ptr.vmem [resolvable:$true] %s913_s16 }
 0x94f   : > { %v758_v48 = vld [vmem:[%s757_s17] sm:$0x3] }
 0x9d1   : > { %v638_v61 = vpop.f32.mrf.mxu2 }
 0x9d2   : > { %v641_v62 = vadd.f32 %v638_v61, %v618_v60 }
 0x9d4   : > { %1177 = vtanh.f32 %v641_v62  ;;  %v1083_v0 = vmul.f32 -1.442695, %v641_v62 }
 0x9d6   : > { %1179 = vpow2.f32 %v1083_v0 }
 0x9da   : > { %v1178_v63 = vpop.eup %1177 }
 0x9db   : > { %664 = vrot.lane.b32.xlu1 %v1178_v63, %s1274_s11 }
 0x9dc   : > { %v1180_v1 = vpop.eup %1179 }
 0x9dd   : > { %v645_v2 = vadd.f32 1.0, %v1180_v1 }
 0x9df   : > { %1181 = vrcp.f32 %v645_v2  ;;  %v657_v8 = vand.u32 2147483648, %v645_v2  ;;  %vm651_vm4 = vweird.f32 %v645_v2  ;;  %v655_v9 = vand.u32 2147483647, %v645_v2 }
 0x9e1   : > { %v658_v11 = vor.u32 1.1754944e-38, %v657_v8  ;;  %vm656_vm8 = vcmp.eq.f32.partialorder %v655_v9, 8.507059e+37 }
 0x9e5   : > { %v1182_v3 = vpop.eup %1181 }
 0x9e6   : > { %v647_v4 = vmul.f32 %v1182_v3, %v645_v2  ;;  %vm652_vm3 = vweird.f32 %v1182_v3 }
 0x9e7   : > { %vm653_vm7 = vmor %vm651_vm4, %vm652_vm3 }
 0x9e8   : > { %v648_v5 = vsub.f32 1.0, %v647_v4 }
 0x9ea   : > { %v649_v6 = vmul.f32 %v1182_v3, %v648_v5 }
 0x9ec   : > { %v650_v7 = vadd.f32 %v1182_v3, %v649_v6 }
 0x9ee   : > { %v654_v10 = vsel %vm653_vm7, %v1182_v3, %v650_v7 }
 0x9ef   : > { %v659_v13 = vsel %vm656_vm8, %v658_v11, %v654_v10 }
 0x9f0   : > { %v662_v15 = vmul.f32 %v659_v13, %v602_v55 }
 0xa4d   : > { %v665_v12 = vpop.permute.xlu1 %664 }
 0xa4e   : > { %v667_v14 = vmul.f32 %v665_v12, %v659_v13 }
 0xa50   : > { %669 = vrot.lane.b32.xlu2 %v667_v14, %s1275_s12 }
 0xaaa   : > { %v670_v16 = vpop.permute.xlu2 %669 }
 0xaab   : > { %v672_v17 = vadd.f32 %v670_v16, %v662_v15 }
 0xaad   : > { %1183 = vtanh.f32 %v672_v17 }
 0xab3   : > { %v1184_v18 = vpop.eup %1183 }
 0xab4   : > { %675 = vrot.lane.b32.xlu0 %v1184_v18, %s1274_s11 }
 0xb26   : > { %v676_v19 = vpop.permute.xlu0 %675 }
 0xb27   : > { %v678_v20 = vmul.f32 %v676_v19, %v659_v13 }
 0xb29   : > { %680 = vrot.lane.b32.xlu1 %v678_v20, %s1275_s12 }
 0xb9b   : > { %v681_v21 = vpop.permute.xlu1 %680 }
 0xb9c   : > { %684 = vst.msk [vmem:[%s683_s6] sm:$0x3] %vm403_vm5, %v681_v21  ;;  %1085 = vmatmul.msk.f32.vlgmr.msrb.gmra.mxu3 %vm336_vm6, %v681_v21  ;;  %s827_s6 = scalar_lea.vmem [#allocation2], %s1090_s26 }
 0xb9d   : > { %v828_v10 = vld [vmem:[%s827_s6] sm:$0x3] }
 0xc1f   : > { %v708_v23 = vpop.f32.mrf.mxu3 }
 0xc20   : > { %v711_v24 = vadd.f32 %v708_v23, %v688_v22 }
 0xc22   : > { %1185 = vtanh.f32 %v711_v24  ;;  %v1086_v26 = vmul.f32 -1.442695, %v711_v24 }
 0xc24   : > { %1187 = vpow2.f32 %v1086_v26 }
 0xc28   : > { %v1186_v25 = vpop.eup %1185 }
 0xc29   : > { %734 = vrot.lane.b32.xlu2 %v1186_v25, %s1274_s11 }
 0xc2a   : > { %v1188_v27 = vpop.eup %1187 }
 0xc2b   : > { %v715_v28 = vadd.f32 1.0, %v1188_v27 }
 0xc2d   : > { %1189 = vrcp.f32 %v715_v28  ;;  %v727_v34 = vand.u32 2147483648, %v715_v28  ;;  %vm721_vm10 = vweird.f32 %v715_v28  ;;  %v725_v35 = vand.u32 2147483647, %v715_v28 }
 0xc2f   : > { %v728_v37 = vor.u32 1.1754944e-38, %v727_v34  ;;  %vm726_vm12 = vcmp.eq.f32.partialorder %v725_v35, 8.507059e+37 }
 0xc33   : > { %v1190_v29 = vpop.eup %1189 }
 0xc34   : > { %v717_v30 = vmul.f32 %v1190_v29, %v715_v28  ;;  %vm722_vm9 = vweird.f32 %v1190_v29 }
 0xc35   : > { %vm723_vm11 = vmor %vm721_vm10, %vm722_vm9 }
 0xc36   : > { %v718_v31 = vsub.f32 1.0, %v717_v30 }
 0xc38   : > { %v719_v32 = vmul.f32 %v1190_v29, %v718_v31 }
 0xc3a   : > { %v720_v33 = vadd.f32 %v1190_v29, %v719_v32 }
 0xc3c   : > { %v724_v36 = vsel %vm723_vm11, %v1190_v29, %v720_v33 }
 0xc3d   : > { %v729_v39 = vsel %vm726_vm12, %v728_v37, %v724_v36 }
 0xc3e   : > { %v732_v41 = vmul.f32 %v729_v39, %v672_v17 }
 0xc83   : > { %v735_v38 = vpop.permute.xlu2 %734 }
 0xc84   : > { %v737_v40 = vmul.f32 %v735_v38, %v729_v39 }
 0xc86   : > { %739 = vrot.lane.b32.xlu0 %v737_v40, %s1275_s12 }
 0xcf8   : > { %v740_v42 = vpop.permute.xlu0 %739 }
 0xcf9   : > { %v742_v43 = vadd.f32 %v740_v42, %v732_v41 }
 0xcfb   : > { %1191 = vtanh.f32 %v742_v43 }
 0xd01   : > { %v1192_v44 = vpop.eup %1191 }
 0xd02   : > { %745 = vrot.lane.b32.xlu1 %v1192_v44, %s1274_s11 }
 0xd74   : > { %v746_v45 = vpop.permute.xlu1 %745 }
 0xd75   : > { %v748_v46 = vmul.f32 %v746_v45, %v729_v39 }
 0xd77   : > { %750 = vrot.lane.b32.xlu2 %v748_v46, %s1275_s12 }
 0xdd1   : > { %v751_v47 = vpop.permute.xlu2 %750 }
 0xdd2   : > { %754 = vst.msk [vmem:[%s753_s10] sm:$0x3] %vm403_vm5, %v751_v47  ;;  %1088 = vmatmul.msk.f32.vlgmr.msra.gmra.mxu1 %vm336_vm6, %v751_v47  ;;  %s912_s10 = scalar_lea.hbm %s1613_s4, %s1100_s7 }
 0xdd3   : > { %s915_s17 = sshll.u32 %s912_s10, 4  ;;  %s916_s17 = int_to_ptr.hbm [resolvable:$true] %s915_s17 }
 0xdd4   : > { %s1223_s7 = sshra.s32 %s916_s17, 4  ;;  %s1224_s7 = int_to_ptr.hbm [resolvable:$true] %s1223_s7 }
 0xdd5   : > { %s1225_s30 = scalar_lea.hbm %s1224_s7, 16  ;;  %p1230_p0 = scmp.lt.s32.totalorder %s1224_s7, %s1613_s4 }
 0xdd6   : > { %p1226_p11 = scmp.ne.s32.totalorder %s1224_s7, %s1225_s30  ;;  %p1231_p1 = scmp.lt.s32.totalorder %s1229_s13, %s1225_s30 }
 0xdd8   : > { %p1227_p12 = pnand %p1226_p11, %p1347_p5  ;;  %p1232_p2 = por %p1231_p1, %p1230_p0 }
 0xdda   : > { %p1228_p13 = pneg %p1227_p12 }
 0xddc   : > { %p1233_p3 = pnand %p1232_p2, %p1228_p13 }
 0xe4f   : > { %v778_v49 = vpop.f32.mrf.mxu1 }
 0xe50   : > { %v781_v50 = vadd.f32 %v778_v49, %v758_v48 }
 0xe52   : > { %1193 = vtanh.f32 %v781_v50  ;;  %v1089_v52 = vmul.f32 -1.442695, %v781_v50 }
 0xe54   : > { %1195 = vpow2.f32 %v1089_v52 }
 0xe58   : > { %v1194_v51 = vpop.eup %1193 }
 0xe59   : > { %804 = vrot.lane.b32.xlu0 %v1194_v51, %s1274_s11 }
 0xe5a   : > { %v1196_v53 = vpop.eup %1195 }
 0xe5b   : > { %v785_v54 = vadd.f32 1.0, %v1196_v53 }
 0xe5d   : > { %1197 = vrcp.f32 %v785_v54  ;;  %v797_v60 = vand.u32 2147483648, %v785_v54  ;;  %vm791_vm14 = vweird.f32 %v785_v54  ;;  %v795_v61 = vand.u32 2147483647, %v785_v54 }
 0xe5f   : > { %v798_v63 = vor.u32 1.1754944e-38, %v797_v60  ;;  %vm796_vm0 = vcmp.eq.f32.partialorder %v795_v61, 8.507059e+37 }
 0xe63   : > { %v1198_v55 = vpop.eup %1197 }
 0xe64   : > { %v787_v56 = vmul.f32 %v1198_v55, %v785_v54  ;;  %vm792_vm13 = vweird.f32 %v1198_v55 }
 0xe65   : > { %vm793_vm15 = vmor %vm791_vm14, %vm792_vm13 }
 0xe66   : > { %v788_v57 = vsub.f32 1.0, %v787_v56 }
 0xe68   : > { %v789_v58 = vmul.f32 %v1198_v55, %v788_v57 }
 0xe6a   : > { %v790_v59 = vadd.f32 %v1198_v55, %v789_v58 }
 0xe6c   : > { %v794_v62 = vsel %vm793_vm15, %v1198_v55, %v790_v59 }
 0xe6d   : > { %v799_v1 = vsel %vm796_vm0, %v798_v63, %v794_v62 }
 0xe6e   : > { %v802_v3 = vmul.f32 %v799_v1, %v742_v43 }
 0xecb   : > { %v805_v0 = vpop.permute.xlu0 %804 }
 0xecc   : > { %v807_v2 = vmul.f32 %v805_v0, %v799_v1 }
 0xece   : > { %809 = vrot.lane.b32.xlu1 %v807_v2, %s1275_s12 }
 0xf40   : > { %v810_v4 = vpop.permute.xlu1 %809 }
 0xf41   : > { %v812_v5 = vadd.f32 %v810_v4, %v802_v3 }
 0xf43   : > { %1199 = vtanh.f32 %v812_v5 }
 0xf49   : > { %v1200_v6 = vpop.eup %1199 }
 0xf4a   : > { %815 = vrot.lane.b32.xlu2 %v1200_v6, %s1274_s11 }
 0xfa4   : > { %v816_v7 = vpop.permute.xlu2 %815 }
 0xfa5   : > { %v818_v8 = vmul.f32 %v816_v7, %v799_v1 }
 0xfa7   : > { %820 = vrot.lane.b32.xlu0 %v818_v8, %s1275_s12 }
0x1019   : > { %v821_v9 = vpop.permute.xlu0 %820 }
0x101a   : > { %824 = vst.msk [vmem:[%s823_s23] sm:$0x3] %vm403_vm5, %v821_v9  ;;  %1091 = vmatmul.msk.f32.vlgmr.msra.gmra.mxu2 %vm336_vm6, %v821_v9  ;;  %s893_s23 = scalar_lea.vmem %s1446_s15, %s1090_s26 [#allocation3] }
0x109d   : > { %v848_v11 = vpop.f32.mrf.mxu2 }
0x109e   : > { %v851_v12 = vadd.f32 %v848_v11, %v828_v10 }
0x10a0   : > { %1201 = vtanh.f32 %v851_v12  ;;  %v1092_v14 = vmul.f32 -1.442695, %v851_v12 }
0x10a2   : > { %1203 = vpow2.f32 %v1092_v14 }
0x10a6   : > { %v1202_v13 = vpop.eup %1201 }
0x10a7   : > { %874 = vrot.lane.b32.xlu1 %v1202_v13, %s1274_s11 }
0x10a8   : > { %v1204_v15 = vpop.eup %1203 }
0x10a9   : > { %v855_v16 = vadd.f32 1.0, %v1204_v15 }
0x10ab   : > { %1205 = vrcp.f32 %v855_v16  ;;  %v867_v22 = vand.u32 2147483648, %v855_v16  ;;  %vm861_vm1 = vweird.f32 %v855_v16  ;;  %v865_v23 = vand.u32 2147483647, %v855_v16 }
0x10ad   : > { %v868_v25 = vor.u32 1.1754944e-38, %v867_v22  ;;  %vm866_vm3 = vcmp.eq.f32.partialorder %v865_v23, 8.507059e+37 }
0x10b1   : > { %v1206_v17 = vpop.eup %1205 }
0x10b2   : > { %v857_v18 = vmul.f32 %v1206_v17, %v855_v16  ;;  %vm862_vm6 = vweird.f32 %v1206_v17 }
0x10b3   : > { %vm863_vm2 = vmor %vm861_vm1, %vm862_vm6 }
0x10b4   : > { %v858_v19 = vsub.f32 1.0, %v857_v18 }
0x10b6   : > { %v859_v20 = vmul.f32 %v1206_v17, %v858_v19 }
0x10b8   : > { %v860_v21 = vadd.f32 %v1206_v17, %v859_v20 }
0x10ba   : > { %v864_v24 = vsel %vm863_vm2, %v1206_v17, %v860_v21 }
0x10bb   : > { %v869_v27 = vsel %vm866_vm3, %v868_v25, %v864_v24 }
0x10bc   : > { %v872_v29 = vmul.f32 %v869_v27, %v812_v5 }
0x1119   : > { %v875_v26 = vpop.permute.xlu1 %874 }
0x111a   : > { %v877_v28 = vmul.f32 %v875_v26, %v869_v27 }
0x111c   : > { %879 = vrot.lane.b32.xlu2 %v877_v28, %s1275_s12 }
0x1176   : > { %v880_v30 = vpop.permute.xlu2 %879 }
0x1177   : > { %v882_v31 = vadd.f32 %v880_v30, %v872_v29 }
0x1179   : > { %1207 = vtanh.f32 %v882_v31 }
0x117f   : > { %v1208_v32 = vpop.eup %1207 }
0x1180   : > { %885 = vrot.lane.b32.xlu0 %v1208_v32, %s1274_s11  ;;  %s267_s11 = scalar_lea.vmem %s1614_s5, %s1067_s14 }
0x11f2   : > { %v886_v33 = vpop.permute.xlu0 %885 }
0x11f3   : > { %v888_v34 = vmul.f32 %v886_v33, %v869_v27 }
0x11f5   : > { %890 = vrot.lane.b32.xlu1 %v888_v34, %s1275_s12 }
0x1267   : > { %v891_v35 = vpop.permute.xlu1 %890 }
0x1268   : > { %894 = vst.msk [vmem:[%s893_s23] sm:$0x3] %vm403_vm5, %v891_v35 }
0x1269   : > { %895 = vst.msk [vmem:[%s267_s11] sm:$0x3] %vm403_vm5, %v891_v35 }
0x126a   : > { %1236 = shalt.err (!%p1233_p3)
}
0x126b   : > { %s1276_s10 = smov 2  }
0x126c   : > { %1101 = dma.vmem_to_hbm [thread:$0]  (%p1347_p5), %s914_s16, 256, %s916_s17, %s897_s8, %s1275_s12, %s1275_s12, %s1276_s10  }
0x126d PF: > { %p1107_p4 = scmp.ge.s32.totalorder %s1271_s21, 2  ;;  %s933_s14 = sand.u32 1, %s1259_s18  }
0x126e   : > { %s934_s23 = scalar_lea.sflag [#allocation4], %s933_s14 }
0x126f   : > { %p1104_p7 = pnand %p1107_p4, %p1351_p6 }
0x1271   : > { %p1105_p8 = pneg %p1104_p7 }
0x1273   : > { %1254 = dma.done.wait (%p1105_p8), %s934_s23, 256  }
0x1274   : > { %1256 = vsyncadd (%p1105_p8), %s934_s23, 4294967040  ;;  %p16_p9 = scmp.ge.s32.totalorder %s1332_s24, 4   ;;  %s1619_s18 = smov %s1263_s19 }
0x1275   : > { %s1620_s19 = smov %s1267_s20  ;;  %s1621_s20 = smov %s1343_s27 }
0x1276   : > { %s1622_s21 = smov %s1332_s24  ;;  %18 = sbr.rel (!%p16_p9) target bundleno = 3 (0x3), region = 112 }
0x127b   :  { %947 = vsyncpa [#allocation4], 1 }
0x127c   :  { %949 = vsyncpa [#allocation4 + $0x1], 1 }

</bundles_post_ra>
